<compile_context>
chip_gen: v5e
topology: v5e:2x2
jax: 0.10.0
libtpu: 0.0.40
codegen_flags: <defaults>
</compile_context>

<pallas_src>
import jax
import jax.numpy as jnp
import numpy as np
from jax.experimental import pallas as pl
from jax.experimental.pallas import tpu as pltpu

EPS = 1e-5   # BatchNorm3d default eps
K = 3        # kernel size
PAD = 1      # padding


def _fused_conv_bn_relu_kernel(pt_ref, wt_ref, gamma_ref, beta_ref, o_ref):
    """Fused Conv3d(im2col matmul) + BatchNorm3d(train stats) + ReLU.

    pt_ref   : (CIN*K^3, N*D*H*W)  transposed im2col patches (lane-dense cols)
    wt_ref   : (COUT, CIN*K^3)     packed conv weights
    gamma_ref: (COUT, 1)           BN weight
    beta_ref : (COUT, 1)           BN bias
    o_ref    : (COUT, N*D*H*W)     channels-first flat output (lane-dense)
    """
    # Single large-contraction matmul on the MXU.
    y = jnp.dot(wt_ref[...], pt_ref[...], preferred_element_type=jnp.float32)

    # Training-mode BatchNorm statistics: per-channel (= per-row) over all
    # (N, D, H, W) positions, biased variance (PyTorch normalization path).
    cnt = y.shape[1]
    mean = jnp.sum(y, axis=1, keepdims=True) * (1.0 / cnt)
    var = jnp.sum(jnp.square(y - mean), axis=1, keepdims=True) * (1.0 / cnt)

    # Fold BN into a single per-channel scale/shift, then FMA + ReLU.
    scale = gamma_ref[...] * jax.lax.rsqrt(var + EPS)
    shift = beta_ref[...] - mean * scale
    o_ref[...] = jnp.maximum(y * scale + shift, 0.0)


@jax.jit
def conv_bn_relu_3d(x_ncdhw, weight, gamma, beta):
    """ConvBnReLU3D forward.

    x_ncdhw: (N, Cin, D, H, W) float32 (PyTorch layout)
    weight : (Cout, Cin, 3, 3, 3) float32
    gamma, beta: (Cout,) float32
    returns: (N, Cout, D, H, W) float32
    """
    N, CIN, D, H, W = x_ncdhw.shape
    COUT = weight.shape[0]
    ndhw = N * D * H * W
    kkk = K * K * K

    # ---- wrapper-side im2col (layout plumbing; all FLOPs stay in-kernel) ----
    # (N, Cin, D, H, W) -> (Cin, N, Dp, Hp, Wp), zero-padded spatially.
    xp = jnp.pad(jnp.transpose(x_ncdhw, (1, 0, 2, 3, 4)),
                 ((0, 0), (0, 0), (PAD, PAD), (PAD, PAD), (PAD, PAD)))
    slabs = [xp[:, :, kd:kd + D, kh:kh + H, kw:kw + W]
             for kd in range(K) for kh in range(K) for kw in range(K)]
    # (Cin, K^3, N, D, H, W) -> (Cin*K^3, N*D*H*W); the long axis is lane-dense.
    patches_t = jnp.stack(slabs, axis=1).reshape(CIN * kkk, ndhw)

    # (Cout, Cin, kd, kh, kw) -> (Cout, Cin*K^3); row order matches patch rows.
    w_packed = weight.reshape(COUT, CIN * kkk)

    out_flat = pl.pallas_call(
        _fused_conv_bn_relu_kernel,
        out_shape=jax.ShapeDtypeStruct((COUT, ndhw), jnp.float32),
        grid=(1,),
        in_specs=[
            pl.BlockSpec((CIN * kkk, ndhw), lambda i: (0, 0)),
            pl.BlockSpec((COUT, CIN * kkk), lambda i: (0, 0)),
            pl.BlockSpec((COUT, 1), lambda i: (0, 0)),
            pl.BlockSpec((COUT, 1), lambda i: (0, 0)),
        ],
        out_specs=pl.BlockSpec((COUT, ndhw), lambda i: (0, 0)),
        compiler_params=pltpu.CompilerParams(
            dimension_semantics=("arbitrary",)),
    )(patches_t, w_packed, gamma.reshape(COUT, 1), beta.reshape(COUT, 1))

    # (Cout, N*D*H*W) -> (N, Cout, D, H, W)
    return jnp.transpose(out_flat.reshape(COUT, N, D, H, W), (1, 0, 2, 3, 4))


def _reference(x_ncdhw, weight, gamma, beta):
    # Pure-JAX reference (conv + training-mode BN + ReLU) for validation.
    x = jnp.transpose(x_ncdhw, (0, 2, 3, 4, 1))
    w = jnp.transpose(weight, (2, 3, 4, 1, 0))  # DHWIO
    y = jax.lax.conv_general_dilated(
        x, w, window_strides=(1, 1, 1), padding=[(PAD, PAD)] * 3,
        dimension_numbers=("NDHWC", "DHWIO", "NDHWC"))
    mean = jnp.mean(y, axis=(0, 1, 2, 3), keepdims=True)
    var = jnp.mean(jnp.square(y - mean), axis=(0, 1, 2, 3), keepdims=True)
    out = (y - mean) * jax.lax.rsqrt(var + EPS) * gamma.reshape(1, 1, 1, 1, -1) \
          + beta.reshape(1, 1, 1, 1, -1)
    out = jnp.maximum(out, 0.0)
    return jnp.transpose(out, (0, 4, 1, 2, 3))


if __name__ == "__main__":
    N, CIN, COUT = 2, 4, 8
    D, H, W = 8, 16, 16

    key = jax.random.PRNGKey(0)
    kx, kw, kg, kb = jax.random.split(key, 4)

    x = jax.random.normal(kx, (N, CIN, D, H, W), dtype=jnp.float32)
    fan_in = CIN * K * K * K
    weight = jax.random.normal(kw, (COUT, CIN, K, K, K),
                               dtype=jnp.float32) / np.sqrt(fan_in)
    gamma = 1.0 + 0.1 * jax.random.normal(kg, (COUT,), dtype=jnp.float32)
    beta = 0.1 * jax.random.normal(kb, (COUT,), dtype=jnp.float32)

    out = jax.block_until_ready(conv_bn_relu_3d(x, weight, gamma, beta))

    ref = _reference(x, weight, gamma, beta)
    np.testing.assert_allclose(np.asarray(out), np.asarray(ref),
                               rtol=1e-4, atol=1e-4)
    print("KERNEL_OK")
</pallas_src>

<mosaic_0001>
module attributes {stable_mosaic.version = 11 : i64} {
  func.func @_fused_conv_bn_relu_kernel(%arg0: i32, %arg1: memref<108x4096xf32, #tpu.memory_space<vmem>>, %arg2: memref<8x108xf32, #tpu.memory_space<vmem>>, %arg3: memref<8x1xf32, #tpu.memory_space<vmem>>, %arg4: memref<8x1xf32, #tpu.memory_space<vmem>>, %arg5: memref<8x4096xf32, #tpu.memory_space<vmem>>) attributes {dimension_semantics = [#tpu.dimension_semantics<arbitrary>], iteration_bounds = array<i64: 1>, scalar_prefetch = 0 : i64, scratch_operands = 0 : i64, tpu.core_type = #tpu.core_type<tc>, window_params = [{pipeline_mode = #tpu.pipeline_mode<synchronous>, transform_indices = @transform_0, window_bounds = array<i64: 108, 4096>}, {pipeline_mode = #tpu.pipeline_mode<synchronous>, transform_indices = @transform_1, window_bounds = array<i64: 8, 108>}, {pipeline_mode = #tpu.pipeline_mode<synchronous>, transform_indices = @transform_2, window_bounds = array<i64: 8, 1>}, {pipeline_mode = #tpu.pipeline_mode<synchronous>, transform_indices = @transform_3, window_bounds = array<i64: 8, 1>}, {pipeline_mode = #tpu.pipeline_mode<synchronous>, transform_indices = @transform_4, window_bounds = array<i64: 8, 4096>}]} {
    %c0 = arith.constant 0 : index
    %c0_0 = arith.constant 0 : index
    %0 = vector.load %arg2[%c0, %c0_0] : memref<8x108xf32, #tpu.memory_space<vmem>>, vector<8x108xf32>
    %c0_1 = arith.constant 0 : index
    %c0_2 = arith.constant 0 : index
    %1 = vector.load %arg1[%c0_1, %c0_2] : memref<108x4096xf32, #tpu.memory_space<vmem>>, vector<108x4096xf32>
    %cst = arith.constant dense<0.000000e+00> : vector<8x4096xf32>
    %2 = tpu.matmul %0, %1, %cst {dimension_numbers = #tpu.dot_dimension_numbers<[1], [0], [0], [1], [0, 0, 1, 1], [], []>} : vector<8x108xf32>, vector<108x4096xf32>, vector<8x4096xf32> -> vector<8x4096xf32>
    %cst_3 = arith.constant dense<0.000000e+00> : vector<8xf32>
    %3 = vector.multi_reduction <add>, %2, %cst_3 [1] : vector<8x4096xf32> to vector<8xf32>
    %4 = vector.shape_cast %3 : vector<8xf32> to vector<8x1xf32>
    %cst_4 = arith.constant 2.44140625E-4 : f32
    %5 = vector.broadcast %cst_4 : f32 to vector<8x1xf32>
    %6 = arith.mulf %4, %5 : vector<8x1xf32>
    %7 = vector.broadcast %6 : vector<8x1xf32> to vector<8x4096xf32>
    %8 = arith.subf %2, %7 : vector<8x4096xf32>
    %9 = arith.mulf %8, %8 : vector<8x4096xf32>
    %cst_5 = arith.constant dense<0.000000e+00> : vector<8xf32>
    %10 = vector.multi_reduction <add>, %9, %cst_5 [1] : vector<8x4096xf32> to vector<8xf32>
    %11 = vector.shape_cast %10 : vector<8xf32> to vector<8x1xf32>
    %cst_6 = arith.constant 2.44140625E-4 : f32
    %12 = vector.broadcast %cst_6 : f32 to vector<8x1xf32>
    %13 = arith.mulf %11, %12 : vector<8x1xf32>
    %c0_7 = arith.constant 0 : index
    %c0_8 = arith.constant 0 : index
    %14 = vector.load %arg3[%c0_7, %c0_8] : memref<8x1xf32, #tpu.memory_space<vmem>>, vector<8x1xf32>
    %cst_9 = arith.constant 9.99999974E-6 : f32
    %15 = vector.broadcast %cst_9 : f32 to vector<8x1xf32>
    %16 = arith.addf %13, %15 : vector<8x1xf32>
    %17 = math.rsqrt %16 : vector<8x1xf32>
    %18 = arith.mulf %14, %17 : vector<8x1xf32>
    %c0_10 = arith.constant 0 : index
    %c0_11 = arith.constant 0 : index
    %19 = vector.load %arg4[%c0_10, %c0_11] : memref<8x1xf32, #tpu.memory_space<vmem>>, vector<8x1xf32>
    %20 = arith.mulf %6, %18 : vector<8x1xf32>
    %21 = arith.subf %19, %20 : vector<8x1xf32>
    %22 = vector.broadcast %18 : vector<8x1xf32> to vector<8x4096xf32>
    %23 = arith.mulf %2, %22 : vector<8x4096xf32>
    %24 = vector.broadcast %21 : vector<8x1xf32> to vector<8x4096xf32>
    %25 = arith.addf %23, %24 : vector<8x4096xf32>
    %cst_12 = arith.constant 0.000000e+00 : f32
    %26 = vector.broadcast %cst_12 : f32 to vector<8x4096xf32>
    %27 = arith.maximumf %25, %26 : vector<8x4096xf32>
    %c0_13 = arith.constant 0 : index
    %c0_14 = arith.constant 0 : index
    %28 = vector.load %arg5[%c0_13, %c0_14] : memref<8x4096xf32, #tpu.memory_space<vmem>>, vector<8x4096xf32>
    tpu.vector_store %arg5[%c0_13, %c0_14], %27 {strides = array<i32>} : memref<8x4096xf32, #tpu.memory_space<vmem>>, vector<8x4096xf32>,
    return
  }
  func.func @transform_0(%arg0: i32) -> (i32, i32) {
    %c0_i32 = arith.constant 0 : i32
    %c0_i32_0 = arith.constant 0 : i32
    %c0_i32_1 = arith.constant 0 : i32
    return %c0_i32, %c0_i32_0 : i32, i32
  }
  func.func @transform_1(%arg0: i32) -> (i32, i32) {
    %c0_i32 = arith.constant 0 : i32
    %c0_i32_0 = arith.constant 0 : i32
    %c0_i32_1 = arith.constant 0 : i32
    return %c0_i32, %c0_i32_0 : i32, i32
  }
  func.func @transform_2(%arg0: i32) -> (i32, i32) {
    %c0_i32 = arith.constant 0 : i32
    %c0_i32_0 = arith.constant 0 : i32
    %c0_i32_1 = arith.constant 0 : i32
    return %c0_i32, %c0_i32_0 : i32, i32
  }
  func.func @transform_3(%arg0: i32) -> (i32, i32) {
    %c0_i32 = arith.constant 0 : i32
    %c0_i32_0 = arith.constant 0 : i32
    %c0_i32_1 = arith.constant 0 : i32
    return %c0_i32, %c0_i32_0 : i32, i32
  }
  func.func @transform_4(%arg0: i32) -> (i32, i32) {
    %c0_i32 = arith.constant 0 : i32
    %c0_i32_0 = arith.constant 0 : i32
    %c0_i32_1 = arith.constant 0 : i32
    return %c0_i32, %c0_i32_0 : i32, i32
  }
}

</mosaic_0001>

<bundles_post_ra>
// kernel: conv_bn_relu_3d.1
= control target key start
LH: loop header
LB: loop body
LE: loop exit
PB: predicated region body
PF: predicated region fallthrough
CT: control target
= control target key end

     0   :  { %vm470_vm0 = vcmask 1043456   ;;  %vm466_vm1 = vcmask 883712   ;;  %s3408_s0 = inlined_call_operand.vmem [shape: f32[108,4096], index: 0, kind: input, shape index: {}]   ;;  %s3409_s1 = inlined_call_operand.vmem [shape: f32[8,108], index: 1, kind: input, shape index: {}]   ;;  %s3410_s2 = inlined_call_operand.vmem [shape: f32[8,1], index: 2, kind: input, shape index: {}]   ;;  %s3411_s3 = inlined_call_operand.vmem [shape: f32[8,1], index: 3, kind: input, shape index: {}]   ;;  %s3412_s4 = inlined_call_operand.vmem [shape: f32[8,4096], index: 4, kind: output, shape index: {}]  }
   0x1   :  { %v434_v0 = vld [vmem:[%s3408_s0 + $0xd00] sm:$0xf]  ;;  %v436_v1 = vld [vmem:[%s3408_s0 + $0xd10] sm:$0xf]  ;;  %v435_v3 = vld [vmem:[%s3408_s0 + $0xd08] sm:$0xf] }
   0x2   :  { %v402_v2 = vld [vmem:[%s3408_s0 + $0xc00] sm:$0xff]  ;;  %1497 = vmatpush.msk.msra.mxu0 %vm470_vm0, %v434_v0  ;;  %1501 = vmatpush.msk.msra.mxu2 %vm470_vm0, %v436_v1  ;;  %v404_v4 = vld [vmem:[%s3408_s0 + $0xc10] sm:$0xff]  ;;  %v437_v5 = vld [vmem:[%s3408_s0 + $0xd18] sm:$0xf] }
   0x3   :  { %1499 = vmatpush.msk.msra.mxu1 %vm470_vm0, %v435_v3  ;;  %1503 = vmatpush.msk.msra.mxu3 %vm470_vm0, %v437_v5  ;;  %v370_v6 = vld [vmem:[%s3408_s0 + $0xb00] sm:$0xff]  ;;  %v403_v7 = vld [vmem:[%s3408_s0 + $0xc08] sm:$0xff]  ;;  %v372_v8 = vld [vmem:[%s3408_s0 + $0xb10] sm:$0xff] }
   0x4   :  { %570 = vmatpush.msra.mxu0 %v402_v2  ;;  %610 = vmatpush.msra.mxu2 %v404_v4  ;;  %v405_v9 = vld [vmem:[%s3408_s0 + $0xc18] sm:$0xff]  ;;  %v371_v10 = vld [vmem:[%s3408_s0 + $0xb08] sm:$0xff]  ;;  %v338_v11 = vld [vmem:[%s3408_s0 + $0xa00] sm:$0xff] }
   0x5   :  { %590 = vmatpush.msra.mxu1 %v403_v7  ;;  %630 = vmatpush.msra.mxu3 %v405_v9  ;;  %v340_v12 = vld [vmem:[%s3408_s0 + $0xa10] sm:$0xff]  ;;  %v373_v13 = vld [vmem:[%s3408_s0 + $0xb18] sm:$0xff]  ;;  %v339_v14 = vld [vmem:[%s3408_s0 + $0xa08] sm:$0xff] }
   0x6   :  { %571 = vmatpush.msra.mxu0 %v370_v6  ;;  %611 = vmatpush.msra.mxu2 %v372_v8  ;;  %v341_v15 = vld [vmem:[%s3408_s0 + $0xa18] sm:$0xff]  ;;  %v306_v16 = vld [vmem:[%s3408_s0 + $0x900] sm:$0xff]  ;;  %v308_v17 = vld [vmem:[%s3408_s0 + $0x910] sm:$0xff] }
   0x7   :  { %591 = vmatpush.msra.mxu1 %v371_v10  ;;  %631 = vmatpush.msra.mxu3 %v373_v13  ;;  %v307_v18 = vld [vmem:[%s3408_s0 + $0x908] sm:$0xff]  ;;  %v309_v19 = vld [vmem:[%s3408_s0 + $0x918] sm:$0xff]  ;;  %v274_v20 = vld [vmem:[%s3408_s0 + $0x800] sm:$0xff] }
   0x8   :  { %572 = vmatpush.msra.mxu0 %v338_v11  ;;  %612 = vmatpush.msra.mxu2 %v340_v12  ;;  %v276_v21 = vld [vmem:[%s3408_s0 + $0x810] sm:$0xff]  ;;  %v275_v22 = vld [vmem:[%s3408_s0 + $0x808] sm:$0xff]  ;;  %v277_v23 = vld [vmem:[%s3408_s0 + $0x818] sm:$0xff] }
   0x9   :  { %592 = vmatpush.msra.mxu1 %v339_v14  ;;  %632 = vmatpush.msra.mxu3 %v341_v15  ;;  %v242_v24 = vld [vmem:[%s3408_s0 + $0x700] sm:$0xff]  ;;  %v244_v25 = vld [vmem:[%s3408_s0 + $0x710] sm:$0xff]  ;;  %v243_v26 = vld [vmem:[%s3408_s0 + $0x708] sm:$0xff] }
   0xa   :  { %573 = vmatpush.msra.mxu0 %v306_v16  ;;  %613 = vmatpush.msra.mxu2 %v308_v17  ;;  %v245_v27 = vld [vmem:[%s3408_s0 + $0x718] sm:$0xff]  ;;  %v210_v28 = vld [vmem:[%s3408_s0 + $0x600] sm:$0xff]  ;;  %v212_v29 = vld [vmem:[%s3408_s0 + $0x610] sm:$0xff] }
   0xb   :  { %593 = vmatpush.msra.mxu1 %v307_v18  ;;  %633 = vmatpush.msra.mxu3 %v309_v19  ;;  %v211_v30 = vld [vmem:[%s3408_s0 + $0x608] sm:$0xff]  ;;  %v213_v31 = vld [vmem:[%s3408_s0 + $0x618] sm:$0xff]  ;;  %v178_v32 = vld [vmem:[%s3408_s0 + $0x500] sm:$0xff] }
   0xc   :  { %574 = vmatpush.msra.mxu0 %v274_v20  ;;  %614 = vmatpush.msra.mxu2 %v276_v21  ;;  %v180_v33 = vld [vmem:[%s3408_s0 + $0x510] sm:$0xff]  ;;  %v179_v34 = vld [vmem:[%s3408_s0 + $0x508] sm:$0xff]  ;;  %v181_v35 = vld [vmem:[%s3408_s0 + $0x518] sm:$0xff] }
   0xd   :  { %594 = vmatpush.msra.mxu1 %v275_v22  ;;  %634 = vmatpush.msra.mxu3 %v277_v23  ;;  %v146_v36 = vld [vmem:[%s3408_s0 + $0x400] sm:$0xff]  ;;  %v148_v37 = vld [vmem:[%s3408_s0 + $0x410] sm:$0xff]  ;;  %v147_v38 = vld [vmem:[%s3408_s0 + $0x408] sm:$0xff] }
   0xe   :  { %575 = vmatpush.msra.mxu0 %v242_v24  ;;  %615 = vmatpush.msra.mxu2 %v244_v25  ;;  %v149_v39 = vld [vmem:[%s3408_s0 + $0x418] sm:$0xff]  ;;  %v114_v40 = vld [vmem:[%s3408_s0 + $0x300] sm:$0xff]  ;;  %v116_v41 = vld [vmem:[%s3408_s0 + $0x310] sm:$0xff] }
   0xf   :  { %595 = vmatpush.msra.mxu1 %v243_v26  ;;  %635 = vmatpush.msra.mxu3 %v245_v27  ;;  %v115_v42 = vld [vmem:[%s3408_s0 + $0x308] sm:$0xff]  ;;  %v117_v43 = vld [vmem:[%s3408_s0 + $0x318] sm:$0xff]  ;;  %v82_v44 = vld [vmem:[%s3408_s0 + $0x200] sm:$0xff] }
  0x10   :  { %576 = vmatpush.msra.mxu0 %v210_v28  ;;  %616 = vmatpush.msra.mxu2 %v212_v29  ;;  %v84_v45 = vld [vmem:[%s3408_s0 + $0x210] sm:$0xff]  ;;  %v83_v46 = vld [vmem:[%s3408_s0 + $0x208] sm:$0xff]  ;;  %v85_v47 = vld [vmem:[%s3408_s0 + $0x218] sm:$0xff] }
  0x11   :  { %596 = vmatpush.msra.mxu1 %v211_v30  ;;  %636 = vmatpush.msra.mxu3 %v213_v31  ;;  %v50_v48 = vld [vmem:[%s3408_s0 + $0x100] sm:$0xff]  ;;  %v52_v49 = vld [vmem:[%s3408_s0 + $0x110] sm:$0xff]  ;;  %v51_v50 = vld [vmem:[%s3408_s0 + $0x108] sm:$0xff] }
  0x12   :  { %577 = vmatpush.msra.mxu0 %v178_v32  ;;  %617 = vmatpush.msra.mxu2 %v180_v33  ;;  %v53_v51 = vld [vmem:[%s3408_s0 + $0x118] sm:$0xff]  ;;  %v18_v52 = vld [vmem:[%s3408_s0] sm:$0xff]  ;;  %v20_v53 = vld [vmem:[%s3408_s0 + $0x10] sm:$0xff] }
  0x13   :  { %597 = vmatpush.msra.mxu1 %v179_v34  ;;  %637 = vmatpush.msra.mxu3 %v181_v35  ;;  %v438_v54 = vld [vmem:[%s3408_s0 + $0xd20] sm:$0xf]  ;;  %v440_v55 = vld [vmem:[%s3408_s0 + $0xd30] sm:$0xf]  ;;  %v19_v56 = vld [vmem:[%s3408_s0 + $0x8] sm:$0xff] }
  0x14   :  { %578 = vmatpush.msra.mxu0 %v146_v36  ;;  %618 = vmatpush.msra.mxu2 %v148_v37  ;;  %v21_v57 = vld [vmem:[%s3408_s0 + $0x18] sm:$0xff]  ;;  %v406_v58 = vld [vmem:[%s3408_s0 + $0xc20] sm:$0xff]  ;;  %v439_v59 = vld [vmem:[%s3408_s0 + $0xd28] sm:$0xf] }
  0x15   :  { %598 = vmatpush.msra.mxu1 %v147_v38  ;;  %638 = vmatpush.msra.mxu3 %v149_v39  ;;  %v408_v60 = vld [vmem:[%s3408_s0 + $0xc30] sm:$0xff]  ;;  %v441_v61 = vld [vmem:[%s3408_s0 + $0xd38] sm:$0xf]  ;;  %v374_v62 = vld [vmem:[%s3408_s0 + $0xb20] sm:$0xff] }
  0x16   :  { %579 = vmatpush.msra.mxu0 %v114_v40  ;;  %619 = vmatpush.msra.mxu2 %v116_v41  ;;  %v407_v63 = vld [vmem:[%s3408_s0 + $0xc28] sm:$0xff]  ;;  %v376_v0 = vld [vmem:[%s3408_s0 + $0xb30] sm:$0xff]  ;;  %v409_v1 = vld [vmem:[%s3408_s0 + $0xc38] sm:$0xff] }
  0x17   :  { %599 = vmatpush.msra.mxu1 %v115_v42  ;;  %639 = vmatpush.msra.mxu3 %v117_v43  ;;  %v342_v2 = vld [vmem:[%s3408_s0 + $0xa20] sm:$0xff]  ;;  %v375_v3 = vld [vmem:[%s3408_s0 + $0xb28] sm:$0xff]  ;;  %v344_v4 = vld [vmem:[%s3408_s0 + $0xa30] sm:$0xff] }
  0x18   :  { %580 = vmatpush.msra.mxu0 %v82_v44  ;;  %620 = vmatpush.msra.mxu2 %v84_v45  ;;  %v377_v5 = vld [vmem:[%s3408_s0 + $0xb38] sm:$0xff]  ;;  %v310_v6 = vld [vmem:[%s3408_s0 + $0x920] sm:$0xff]  ;;  %v343_v7 = vld [vmem:[%s3408_s0 + $0xa28] sm:$0xff] }
  0x19   :  { %600 = vmatpush.msra.mxu1 %v83_v46  ;;  %640 = vmatpush.msra.mxu3 %v85_v47  ;;  %v312_v8 = vld [vmem:[%s3408_s0 + $0x930] sm:$0xff]  ;;  %v345_v9 = vld [vmem:[%s3408_s0 + $0xa38] sm:$0xff]  ;;  %v278_v10 = vld [vmem:[%s3408_s0 + $0x820] sm:$0xff] }
  0x1a   :  { %581 = vmatpush.msra.mxu0 %v50_v48  ;;  %621 = vmatpush.msra.mxu2 %v52_v49  ;;  %v311_v11 = vld [vmem:[%s3408_s0 + $0x928] sm:$0xff]  ;;  %v280_v12 = vld [vmem:[%s3408_s0 + $0x830] sm:$0xff]  ;;  %v313_v13 = vld [vmem:[%s3408_s0 + $0x938] sm:$0xff] }
  0x1b   :  { %601 = vmatpush.msra.mxu1 %v51_v50  ;;  %641 = vmatpush.msra.mxu3 %v53_v51  ;;  %v246_v14 = vld [vmem:[%s3408_s0 + $0x720] sm:$0xff]  ;;  %v279_v15 = vld [vmem:[%s3408_s0 + $0x828] sm:$0xff]  ;;  %v248_v16 = vld [vmem:[%s3408_s0 + $0x730] sm:$0xff] }
  0x1c   :  { %582 = vmatpush.msra.mxu0 %v18_v52  ;;  %622 = vmatpush.msra.mxu2 %v20_v53  ;;  %v281_v17 = vld [vmem:[%s3408_s0 + $0x838] sm:$0xff]  ;;  %v214_v18 = vld [vmem:[%s3408_s0 + $0x620] sm:$0xff]  ;;  %v247_v19 = vld [vmem:[%s3408_s0 + $0x728] sm:$0xff] }
  0x1d   :  { %602 = vmatpush.msra.mxu1 %v19_v56  ;;  %642 = vmatpush.msra.mxu3 %v21_v57  ;;  %v216_v20 = vld [vmem:[%s3408_s0 + $0x630] sm:$0xff]  ;;  %v249_v21 = vld [vmem:[%s3408_s0 + $0x738] sm:$0xff]  ;;  %v182_v22 = vld [vmem:[%s3408_s0 + $0x520] sm:$0xff] }
  0x1e   :  { %1505 = vmatpush.msk.msrb.mxu0 %vm470_vm0, %v438_v54  ;;  %1509 = vmatpush.msk.msrb.mxu2 %vm470_vm0, %v440_v55  ;;  %v215_v23 = vld [vmem:[%s3408_s0 + $0x628] sm:$0xff]  ;;  %v184_v24 = vld [vmem:[%s3408_s0 + $0x530] sm:$0xff]  ;;  %v217_v25 = vld [vmem:[%s3408_s0 + $0x638] sm:$0xff] }
  0x1f   :  { %1507 = vmatpush.msk.msrb.mxu1 %vm470_vm0, %v439_v59  ;;  %1511 = vmatpush.msk.msrb.mxu3 %vm470_vm0, %v441_v61  ;;  %v150_v26 = vld [vmem:[%s3408_s0 + $0x420] sm:$0xff]  ;;  %v183_v27 = vld [vmem:[%s3408_s0 + $0x528] sm:$0xff]  ;;  %v152_v28 = vld [vmem:[%s3408_s0 + $0x430] sm:$0xff] }
  0x20   :  { %650 = vmatpush.msrb.mxu0 %v406_v58  ;;  %690 = vmatpush.msrb.mxu2 %v408_v60  ;;  %v185_v29 = vld [vmem:[%s3408_s0 + $0x538] sm:$0xff]  ;;  %v118_v30 = vld [vmem:[%s3408_s0 + $0x320] sm:$0xff]  ;;  %v151_v31 = vld [vmem:[%s3408_s0 + $0x428] sm:$0xff] }
  0x21   :  { %670 = vmatpush.msrb.mxu1 %v407_v63  ;;  %710 = vmatpush.msrb.mxu3 %v409_v1  ;;  %v120_v32 = vld [vmem:[%s3408_s0 + $0x330] sm:$0xff]  ;;  %v153_v33 = vld [vmem:[%s3408_s0 + $0x438] sm:$0xff]  ;;  %v86_v34 = vld [vmem:[%s3408_s0 + $0x220] sm:$0xff] }
  0x22   :  { %651 = vmatpush.msrb.mxu0 %v374_v62  ;;  %691 = vmatpush.msrb.mxu2 %v376_v0  ;;  %v119_v35 = vld [vmem:[%s3408_s0 + $0x328] sm:$0xff]  ;;  %v88_v36 = vld [vmem:[%s3408_s0 + $0x230] sm:$0xff]  ;;  %v121_v37 = vld [vmem:[%s3408_s0 + $0x338] sm:$0xff] }
  0x23   :  { %671 = vmatpush.msrb.mxu1 %v375_v3  ;;  %711 = vmatpush.msrb.mxu3 %v377_v5  ;;  %v54_v38 = vld [vmem:[%s3408_s0 + $0x120] sm:$0xff]  ;;  %v87_v39 = vld [vmem:[%s3408_s0 + $0x228] sm:$0xff]  ;;  %v56_v40 = vld [vmem:[%s3408_s0 + $0x130] sm:$0xff] }
  0x24   :  { %652 = vmatpush.msrb.mxu0 %v342_v2  ;;  %692 = vmatpush.msrb.mxu2 %v344_v4  ;;  %v89_v41 = vld [vmem:[%s3408_s0 + $0x238] sm:$0xff]  ;;  %v1922_v42 = vld [vmem:[%s3409_s1] sm:$0xff]  ;;  %v55_v44 = vld [vmem:[%s3408_s0 + $0x128] sm:$0xff] }
  0x25   :  { %672 = vmatpush.msrb.mxu1 %v343_v7  ;;  %712 = vmatpush.msrb.mxu3 %v345_v9  ;;  %v22_v43 = vld [vmem:[%s3408_s0 + $0x20] sm:$0xff]  ;;  %v24_v45 = vld [vmem:[%s3408_s0 + $0x30] sm:$0xff]  ;;  %v57_v46 = vld [vmem:[%s3408_s0 + $0x138] sm:$0xff] }
  0x26   :  { %653 = vmatpush.msrb.mxu0 %v310_v6  ;;  %693 = vmatpush.msrb.mxu2 %v312_v8  ;;  %v442_v47 = vld [vmem:[%s3408_s0 + $0xd40] sm:$0xf]  ;;  %v444_v48 = vld [vmem:[%s3408_s0 + $0xd50] sm:$0xf]  ;;  %v23_v49 = vld [vmem:[%s3408_s0 + $0x28] sm:$0xff] }
  0x27   :  { %673 = vmatpush.msrb.mxu1 %v311_v11  ;;  %713 = vmatpush.msrb.mxu3 %v313_v13  ;;  %v25_v50 = vld [vmem:[%s3408_s0 + $0x38] sm:$0xff]  ;;  %v410_v51 = vld [vmem:[%s3408_s0 + $0xc40] sm:$0xff]  ;;  %v443_v52 = vld [vmem:[%s3408_s0 + $0xd48] sm:$0xf] }
  0x28   :  { %654 = vmatpush.msrb.mxu0 %v278_v10  ;;  %694 = vmatpush.msrb.mxu2 %v280_v12  ;;  %v412_v53 = vld [vmem:[%s3408_s0 + $0xc50] sm:$0xff]  ;;  %v445_v54 = vld [vmem:[%s3408_s0 + $0xd58] sm:$0xf]  ;;  %v378_v55 = vld [vmem:[%s3408_s0 + $0xb40] sm:$0xff] }
  0x29   :  { %674 = vmatpush.msrb.mxu1 %v279_v15  ;;  %714 = vmatpush.msrb.mxu3 %v281_v17  ;;  %v411_v56 = vld [vmem:[%s3408_s0 + $0xc48] sm:$0xff]  ;;  %v380_v57 = vld [vmem:[%s3408_s0 + $0xb50] sm:$0xff]  ;;  %v413_v58 = vld [vmem:[%s3408_s0 + $0xc58] sm:$0xff] }
  0x2a   :  { %655 = vmatpush.msrb.mxu0 %v246_v14  ;;  %695 = vmatpush.msrb.mxu2 %v248_v16  ;;  %v346_v59 = vld [vmem:[%s3408_s0 + $0xa40] sm:$0xff]  ;;  %v379_v60 = vld [vmem:[%s3408_s0 + $0xb48] sm:$0xff]  ;;  %v348_v61 = vld [vmem:[%s3408_s0 + $0xa50] sm:$0xff] }
  0x2b   :  { %675 = vmatpush.msrb.mxu1 %v247_v19  ;;  %715 = vmatpush.msrb.mxu3 %v249_v21  ;;  %v381_v62 = vld [vmem:[%s3408_s0 + $0xb58] sm:$0xff]  ;;  %v314_v63 = vld [vmem:[%s3408_s0 + $0x940] sm:$0xff]  ;;  %v347_v0 = vld [vmem:[%s3408_s0 + $0xa48] sm:$0xff] }
  0x2c   :  { %656 = vmatpush.msrb.mxu0 %v214_v18  ;;  %696 = vmatpush.msrb.mxu2 %v216_v20  ;;  %v316_v1 = vld [vmem:[%s3408_s0 + $0x950] sm:$0xff]  ;;  %v349_v2 = vld [vmem:[%s3408_s0 + $0xa58] sm:$0xff]  ;;  %v282_v3 = vld [vmem:[%s3408_s0 + $0x840] sm:$0xff] }
  0x2d   :  { %676 = vmatpush.msrb.mxu1 %v215_v23  ;;  %716 = vmatpush.msrb.mxu3 %v217_v25  ;;  %v315_v4 = vld [vmem:[%s3408_s0 + $0x948] sm:$0xff]  ;;  %v284_v5 = vld [vmem:[%s3408_s0 + $0x850] sm:$0xff]  ;;  %v317_v6 = vld [vmem:[%s3408_s0 + $0x958] sm:$0xff] }
  0x2e   :  { %657 = vmatpush.msrb.mxu0 %v182_v22  ;;  %697 = vmatpush.msrb.mxu2 %v184_v24  ;;  %v250_v7 = vld [vmem:[%s3408_s0 + $0x740] sm:$0xff]  ;;  %v283_v8 = vld [vmem:[%s3408_s0 + $0x848] sm:$0xff]  ;;  %v252_v9 = vld [vmem:[%s3408_s0 + $0x750] sm:$0xff] }
  0x2f   :  { %677 = vmatpush.msrb.mxu1 %v183_v27  ;;  %717 = vmatpush.msrb.mxu3 %v185_v29  ;;  %v285_v10 = vld [vmem:[%s3408_s0 + $0x858] sm:$0xff]  ;;  %v218_v11 = vld [vmem:[%s3408_s0 + $0x640] sm:$0xff]  ;;  %v251_v12 = vld [vmem:[%s3408_s0 + $0x748] sm:$0xff] }
  0x30   :  { %658 = vmatpush.msrb.mxu0 %v150_v26  ;;  %698 = vmatpush.msrb.mxu2 %v152_v28  ;;  %v220_v13 = vld [vmem:[%s3408_s0 + $0x650] sm:$0xff]  ;;  %v253_v14 = vld [vmem:[%s3408_s0 + $0x758] sm:$0xff]  ;;  %v186_v15 = vld [vmem:[%s3408_s0 + $0x540] sm:$0xff] }
  0x31   :  { %678 = vmatpush.msrb.mxu1 %v151_v31  ;;  %718 = vmatpush.msrb.mxu3 %v153_v33  ;;  %v219_v16 = vld [vmem:[%s3408_s0 + $0x648] sm:$0xff]  ;;  %v188_v17 = vld [vmem:[%s3408_s0 + $0x550] sm:$0xff]  ;;  %v221_v18 = vld [vmem:[%s3408_s0 + $0x658] sm:$0xff] }
  0x32   :  { %659 = vmatpush.msrb.mxu0 %v118_v30  ;;  %699 = vmatpush.msrb.mxu2 %v120_v32  ;;  %v154_v19 = vld [vmem:[%s3408_s0 + $0x440] sm:$0xff]  ;;  %v187_v20 = vld [vmem:[%s3408_s0 + $0x548] sm:$0xff]  ;;  %v156_v21 = vld [vmem:[%s3408_s0 + $0x450] sm:$0xff] }
  0x33   :  { %679 = vmatpush.msrb.mxu1 %v119_v35  ;;  %719 = vmatpush.msrb.mxu3 %v121_v37  ;;  %v189_v22 = vld [vmem:[%s3408_s0 + $0x558] sm:$0xff]  ;;  %v122_v23 = vld [vmem:[%s3408_s0 + $0x340] sm:$0xff]  ;;  %v155_v24 = vld [vmem:[%s3408_s0 + $0x448] sm:$0xff] }
  0x34   :  { %660 = vmatpush.msrb.mxu0 %v86_v34  ;;  %700 = vmatpush.msrb.mxu2 %v88_v36  ;;  %v124_v25 = vld [vmem:[%s3408_s0 + $0x350] sm:$0xff]  ;;  %v157_v26 = vld [vmem:[%s3408_s0 + $0x458] sm:$0xff]  ;;  %v90_v27 = vld [vmem:[%s3408_s0 + $0x240] sm:$0xff] }
  0x35   :  { %680 = vmatpush.msrb.mxu1 %v87_v39  ;;  %720 = vmatpush.msrb.mxu3 %v89_v41  ;;  %v123_v28 = vld [vmem:[%s3408_s0 + $0x348] sm:$0xff]  ;;  %v92_v29 = vld [vmem:[%s3408_s0 + $0x250] sm:$0xff]  ;;  %v125_v30 = vld [vmem:[%s3408_s0 + $0x358] sm:$0xff] }
  0x36   :  { %661 = vmatpush.msrb.mxu0 %v54_v38  ;;  %701 = vmatpush.msrb.mxu2 %v56_v40  ;;  %v58_v31 = vld [vmem:[%s3408_s0 + $0x140] sm:$0xff]  ;;  %v91_v32 = vld [vmem:[%s3408_s0 + $0x248] sm:$0xff]  ;;  %v60_v33 = vld [vmem:[%s3408_s0 + $0x150] sm:$0xff] }
  0x37   :  { %1502 = vmatmul.msk.f32.vlgmr.msra.gmra.mxu2 %vm466_vm1, %v1922_v42  ;;  %681 = vmatpush.msrb.mxu1 %v55_v44  ;;  %v93_v34 = vld [vmem:[%s3408_s0 + $0x258] sm:$0xff]  ;;  %v26_v35 = vld [vmem:[%s3408_s0 + $0x40] sm:$0xff]  ;;  %v59_v36 = vld [vmem:[%s3408_s0 + $0x148] sm:$0xff] }
  0x38   :  { %662 = vmatpush.msrb.mxu0 %v22_v43  ;;  %702 = vmatpush.msrb.mxu2 %v24_v45  ;;  %v28_v37 = vld [vmem:[%s3408_s0 + $0x50] sm:$0xff]  ;;  %v61_v38 = vld [vmem:[%s3408_s0 + $0x158] sm:$0xff]  ;;  %v446_v39 = vld [vmem:[%s3408_s0 + $0xd60] sm:$0xf] }
  0x39   :  { %721 = vmatpush.msrb.mxu3 %v57_v46  ;;  %1498 = vmatmul.msk.f32.vlgmr.msra.gmra.mxu0 %vm466_vm1, %v1922_v42  ;;  %v448_v40 = vld [vmem:[%s3408_s0 + $0xd70] sm:$0xf]  ;;  %v27_v41 = vld [vmem:[%s3408_s0 + $0x48] sm:$0xff]  ;;  %v29_v43 = vld [vmem:[%s3408_s0 + $0x58] sm:$0xff] }
  0x3a   :  { %1504 = vmatmul.msk.f32.vlgmr.msra.gmra.mxu3 %vm466_vm1, %v1922_v42  ;;  %1513 = vmatpush.msk.msra.mxu0 %vm470_vm0, %v442_v47  ;;  %v414_v44 = vld [vmem:[%s3408_s0 + $0xc60] sm:$0xff]  ;;  %v447_v45 = vld [vmem:[%s3408_s0 + $0xd68] sm:$0xf]  ;;  %v416_v46 = vld [vmem:[%s3408_s0 + $0xc70] sm:$0xff] }
  0x3b   :  { %1517 = vmatpush.msk.msra.mxu2 %vm470_vm0, %v444_v48  ;;  %682 = vmatpush.msrb.mxu1 %v23_v49  ;;  %v449_v47 = vld [vmem:[%s3408_s0 + $0xd78] sm:$0xf]  ;;  %v382_v48 = vld [vmem:[%s3408_s0 + $0xb60] sm:$0xff]  ;;  %v415_v49 = vld [vmem:[%s3408_s0 + $0xc68] sm:$0xff] }
  0x3c   :  { %722 = vmatpush.msrb.mxu3 %v25_v50  ;;  %1500 = vmatmul.msk.f32.vlgmr.msra.gmra.mxu1 %vm466_vm1, %v1922_v42  ;;  %v384_v50 = vld [vmem:[%s3408_s0 + $0xb70] sm:$0xff] }
  0x3d   :  { %730 = vmatpush.msra.mxu0 %v410_v51  ;;  %1515 = vmatpush.msk.msra.mxu1 %vm470_vm0, %v443_v52  ;;  %v417_v51 = vld [vmem:[%s3408_s0 + $0xc78] sm:$0xff]  ;;  %v350_v52 = vld [vmem:[%s3408_s0 + $0xa60] sm:$0xff] }
  0x3e   :  { %770 = vmatpush.msra.mxu2 %v412_v53  ;;  %1519 = vmatpush.msk.msra.mxu3 %vm470_vm0, %v445_v54  ;;  %v383_v53 = vld [vmem:[%s3408_s0 + $0xb68] sm:$0xff]  ;;  %v352_v54 = vld [vmem:[%s3408_s0 + $0xa70] sm:$0xff] }
  0x3f   :  { %731 = vmatpush.msra.mxu0 %v378_v55  ;;  %750 = vmatpush.msra.mxu1 %v411_v56  ;;  %v385_v55 = vld [vmem:[%s3408_s0 + $0xb78] sm:$0xff]  ;;  %v318_v56 = vld [vmem:[%s3408_s0 + $0x960] sm:$0xff] }
  0x40   :  { %771 = vmatpush.msra.mxu2 %v380_v57  ;;  %790 = vmatpush.msra.mxu3 %v413_v58  ;;  %v351_v57 = vld [vmem:[%s3408_s0 + $0xa68] sm:$0xff]  ;;  %v320_v58 = vld [vmem:[%s3408_s0 + $0x970] sm:$0xff] }
  0x41   :  { %1510 = vmatmul.msk.f32.vlgmr.msrb.gmra.mxu2 %vm466_vm1, %v1922_v42  ;;  %732 = vmatpush.msra.mxu0 %v346_v59  ;;  %v353_v59 = vld [vmem:[%s3408_s0 + $0xa78] sm:$0xff] }
  0x42   :  { %751 = vmatpush.msra.mxu1 %v379_v60  ;;  %772 = vmatpush.msra.mxu2 %v348_v61  ;;  %v286_v60 = vld [vmem:[%s3408_s0 + $0x860] sm:$0xff]  ;;  %v319_v61 = vld [vmem:[%s3408_s0 + $0x968] sm:$0xff] }
  0x43   :  { %791 = vmatpush.msra.mxu3 %v381_v62  ;;  %1506 = vmatmul.msk.f32.vlgmr.msrb.gmra.mxu0 %vm466_vm1, %v1922_v42  ;;  %v288_v62 = vld [vmem:[%s3408_s0 + $0x870] sm:$0xff] }
  0x44   :  { %1512 = vmatmul.msk.f32.vlgmr.msrb.gmra.mxu3 %vm466_vm1, %v1922_v42  ;;  %733 = vmatpush.msra.mxu0 %v314_v63  ;;  %v321_v63 = vld [vmem:[%s3408_s0 + $0x978] sm:$0xff] }
  0x45   :  { %752 = vmatpush.msra.mxu1 %v347_v0  ;;  %773 = vmatpush.msra.mxu2 %v316_v1  ;;  %v254_v0 = vld [vmem:[%s3408_s0 + $0x760] sm:$0xff]  ;;  %v287_v1 = vld [vmem:[%s3408_s0 + $0x868] sm:$0xff] }
  0x46   :  { %792 = vmatpush.msra.mxu3 %v349_v2  ;;  %1508 = vmatmul.msk.f32.vlgmr.msrb.gmra.mxu1 %vm466_vm1, %v1922_v42  ;;  %v256_v2 = vld [vmem:[%s3408_s0 + $0x770] sm:$0xff] }
  0x47   :  { %734 = vmatpush.msra.mxu0 %v282_v3  ;;  %753 = vmatpush.msra.mxu1 %v315_v4  ;;  %v289_v3 = vld [vmem:[%s3408_s0 + $0x878] sm:$0xff]  ;;  %v222_v4 = vld [vmem:[%s3408_s0 + $0x660] sm:$0xff] }
  0x48   :  { %774 = vmatpush.msra.mxu2 %v284_v5  ;;  %793 = vmatpush.msra.mxu3 %v317_v6  ;;  %v255_v5 = vld [vmem:[%s3408_s0 + $0x768] sm:$0xff]  ;;  %v224_v6 = vld [vmem:[%s3408_s0 + $0x670] sm:$0xff] }
  0x49   :  { %735 = vmatpush.msra.mxu0 %v250_v7  ;;  %754 = vmatpush.msra.mxu1 %v283_v8  ;;  %v257_v7 = vld [vmem:[%s3408_s0 + $0x778] sm:$0xff]  ;;  %v190_v8 = vld [vmem:[%s3408_s0 + $0x560] sm:$0xff] }
  0x4a   :  { %775 = vmatpush.msra.mxu2 %v252_v9  ;;  %794 = vmatpush.msra.mxu3 %v285_v10  ;;  %v223_v9 = vld [vmem:[%s3408_s0 + $0x668] sm:$0xff]  ;;  %v192_v10 = vld [vmem:[%s3408_s0 + $0x570] sm:$0xff] }
  0x4b   :  { %736 = vmatpush.msra.mxu0 %v218_v11  ;;  %755 = vmatpush.msra.mxu1 %v251_v12  ;;  %v225_v11 = vld [vmem:[%s3408_s0 + $0x678] sm:$0xff]  ;;  %v158_v12 = vld [vmem:[%s3408_s0 + $0x460] sm:$0xff] }
  0x4c   :  { %776 = vmatpush.msra.mxu2 %v220_v13  ;;  %795 = vmatpush.msra.mxu3 %v253_v14  ;;  %v191_v13 = vld [vmem:[%s3408_s0 + $0x568] sm:$0xff]  ;;  %v160_v14 = vld [vmem:[%s3408_s0 + $0x470] sm:$0xff] }
  0x4d   :  { %737 = vmatpush.msra.mxu0 %v186_v15  ;;  %756 = vmatpush.msra.mxu1 %v219_v16  ;;  %v193_v15 = vld [vmem:[%s3408_s0 + $0x578] sm:$0xff]  ;;  %v126_v16 = vld [vmem:[%s3408_s0 + $0x360] sm:$0xff] }
  0x4e   :  { %777 = vmatpush.msra.mxu2 %v188_v17  ;;  %796 = vmatpush.msra.mxu3 %v221_v18  ;;  %v159_v17 = vld [vmem:[%s3408_s0 + $0x468] sm:$0xff]  ;;  %v128_v18 = vld [vmem:[%s3408_s0 + $0x370] sm:$0xff] }
  0x4f   :  { %738 = vmatpush.msra.mxu0 %v154_v19  ;;  %757 = vmatpush.msra.mxu1 %v187_v20  ;;  %v161_v19 = vld [vmem:[%s3408_s0 + $0x478] sm:$0xff]  ;;  %v94_v20 = vld [vmem:[%s3408_s0 + $0x260] sm:$0xff] }
  0x50   :  { %778 = vmatpush.msra.mxu2 %v156_v21  ;;  %797 = vmatpush.msra.mxu3 %v189_v22  ;;  %v127_v21 = vld [vmem:[%s3408_s0 + $0x368] sm:$0xff]  ;;  %v96_v22 = vld [vmem:[%s3408_s0 + $0x270] sm:$0xff] }
  0x51   :  { %739 = vmatpush.msra.mxu0 %v122_v23  ;;  %758 = vmatpush.msra.mxu1 %v155_v24  ;;  %v129_v23 = vld [vmem:[%s3408_s0 + $0x378] sm:$0xff]  ;;  %v62_v24 = vld [vmem:[%s3408_s0 + $0x160] sm:$0xff] }
  0x52   :  { %779 = vmatpush.msra.mxu2 %v124_v25  ;;  %798 = vmatpush.msra.mxu3 %v157_v26  ;;  %v95_v25 = vld [vmem:[%s3408_s0 + $0x268] sm:$0xff]  ;;  %v64_v26 = vld [vmem:[%s3408_s0 + $0x170] sm:$0xff] }
  0x53   :  { %740 = vmatpush.msra.mxu0 %v90_v27  ;;  %759 = vmatpush.msra.mxu1 %v123_v28  ;;  %v97_v27 = vld [vmem:[%s3408_s0 + $0x278] sm:$0xff]  ;;  %v30_v28 = vld [vmem:[%s3408_s0 + $0x60] sm:$0xff] }
  0x54   :  { %780 = vmatpush.msra.mxu2 %v92_v29  ;;  %799 = vmatpush.msra.mxu3 %v125_v30  ;;  %v63_v29 = vld [vmem:[%s3408_s0 + $0x168] sm:$0xff]  ;;  %v32_v30 = vld [vmem:[%s3408_s0 + $0x70] sm:$0xff] }
  0x55   :  { %741 = vmatpush.msra.mxu0 %v58_v31  ;;  %760 = vmatpush.msra.mxu1 %v91_v32  ;;  %v65_v31 = vld [vmem:[%s3408_s0 + $0x178] sm:$0xff]  ;;  %v450_v32 = vld [vmem:[%s3408_s0 + $0xd80] sm:$0xf] }
  0x56   :  { %781 = vmatpush.msra.mxu2 %v60_v33  ;;  %800 = vmatpush.msra.mxu3 %v93_v34  ;;  %v452_v33 = vld [vmem:[%s3408_s0 + $0xd90] sm:$0xf]  ;;  %v31_v34 = vld [vmem:[%s3408_s0 + $0x68] sm:$0xff] }
  0x57   :  { %742 = vmatpush.msra.mxu0 %v26_v35  ;;  %761 = vmatpush.msra.mxu1 %v59_v36  ;;  %v33_v35 = vld [vmem:[%s3408_s0 + $0x78] sm:$0xff]  ;;  %v418_v36 = vld [vmem:[%s3408_s0 + $0xc80] sm:$0xff] }
  0x58   :  { %782 = vmatpush.msra.mxu2 %v28_v37  ;;  %801 = vmatpush.msra.mxu3 %v61_v38  ;;  %v451_v37 = vld [vmem:[%s3408_s0 + $0xd88] sm:$0xf]  ;;  %v420_v38 = vld [vmem:[%s3408_s0 + $0xc90] sm:$0xff] }
  0x59   :  { %1514 = vmatmul.msk.f32.vlgmr.msra.gmra.mxu0 %vm466_vm1, %v1922_v42  ;;  %1518 = vmatmul.msk.f32.vlgmr.msra.gmra.mxu2 %vm466_vm1, %v1922_v42 }
  0x5a   :  { %1521 = vmatpush.msk.msrb.mxu0 %vm470_vm0, %v446_v39  ;;  %1525 = vmatpush.msk.msrb.mxu2 %vm470_vm0, %v448_v40  ;;  %v453_v39 = vld [vmem:[%s3408_s0 + $0xd98] sm:$0xf]  ;;  %v386_v40 = vld [vmem:[%s3408_s0 + $0xb80] sm:$0xff] }
  0x5b   :  { %762 = vmatpush.msra.mxu1 %v27_v41  ;;  %802 = vmatpush.msra.mxu3 %v29_v43  ;;  %v419_v41 = vld [vmem:[%s3408_s0 + $0xc88] sm:$0xff]  ;;  %v388_v43 = vld [vmem:[%s3408_s0 + $0xb90] sm:$0xff] }
  0x5c   :  { %1516 = vmatmul.msk.f32.vlgmr.msra.gmra.mxu1 %vm466_vm1, %v1922_v42  ;;  %1520 = vmatmul.msk.f32.vlgmr.msra.gmra.mxu3 %vm466_vm1, %v1922_v42 }
  0x5d   :  { %810 = vmatpush.msrb.mxu0 %v414_v44  ;;  %1523 = vmatpush.msk.msrb.mxu1 %vm470_vm0, %v447_v45  ;;  %v421_v44 = vld [vmem:[%s3408_s0 + $0xc98] sm:$0xff]  ;;  %v354_v45 = vld [vmem:[%s3408_s0 + $0xa80] sm:$0xff] }
  0x5e   :  { %850 = vmatpush.msrb.mxu2 %v416_v46  ;;  %1527 = vmatpush.msk.msrb.mxu3 %vm470_vm0, %v449_v47  ;;  %v387_v46 = vld [vmem:[%s3408_s0 + $0xb88] sm:$0xff]  ;;  %v356_v47 = vld [vmem:[%s3408_s0 + $0xa90] sm:$0xff] }
  0x5f   :  { %811 = vmatpush.msrb.mxu0 %v382_v48  ;;  %830 = vmatpush.msrb.mxu1 %v415_v49  ;;  %v389_v48 = vld [vmem:[%s3408_s0 + $0xb98] sm:$0xff]  ;;  %v322_v49 = vld [vmem:[%s3408_s0 + $0x980] sm:$0xff] }
  0x60   :  { %851 = vmatpush.msrb.mxu2 %v384_v50  ;;  %870 = vmatpush.msrb.mxu3 %v417_v51  ;;  %v355_v50 = vld [vmem:[%s3408_s0 + $0xa88] sm:$0xff]  ;;  %v324_v51 = vld [vmem:[%s3408_s0 + $0x990] sm:$0xff] }
  0x61   :  { %812 = vmatpush.msrb.mxu0 %v350_v52  ;;  %831 = vmatpush.msrb.mxu1 %v383_v53  ;;  %v357_v52 = vld [vmem:[%s3408_s0 + $0xa98] sm:$0xff]  ;;  %v290_v53 = vld [vmem:[%s3408_s0 + $0x880] sm:$0xff] }
  0x62   :  { %852 = vmatpush.msrb.mxu2 %v352_v54  ;;  %871 = vmatpush.msrb.mxu3 %v385_v55  ;;  %v323_v54 = vld [vmem:[%s3408_s0 + $0x988] sm:$0xff]  ;;  %v292_v55 = vld [vmem:[%s3408_s0 + $0x890] sm:$0xff] }
  0x63   :  { %813 = vmatpush.msrb.mxu0 %v318_v56  ;;  %832 = vmatpush.msrb.mxu1 %v351_v57  ;;  %v325_v56 = vld [vmem:[%s3408_s0 + $0x998] sm:$0xff]  ;;  %v258_v57 = vld [vmem:[%s3408_s0 + $0x780] sm:$0xff] }
  0x64   :  { %853 = vmatpush.msrb.mxu2 %v320_v58  ;;  %872 = vmatpush.msrb.mxu3 %v353_v59  ;;  %v291_v58 = vld [vmem:[%s3408_s0 + $0x888] sm:$0xff]  ;;  %v260_v59 = vld [vmem:[%s3408_s0 + $0x790] sm:$0xff] }
  0x65   :  { %814 = vmatpush.msrb.mxu0 %v286_v60  ;;  %833 = vmatpush.msrb.mxu1 %v319_v61  ;;  %v293_v60 = vld [vmem:[%s3408_s0 + $0x898] sm:$0xff]  ;;  %v226_v61 = vld [vmem:[%s3408_s0 + $0x680] sm:$0xff] }
  0x66   :  { %854 = vmatpush.msrb.mxu2 %v288_v62  ;;  %873 = vmatpush.msrb.mxu3 %v321_v63  ;;  %v259_v62 = vld [vmem:[%s3408_s0 + $0x788] sm:$0xff]  ;;  %v228_v63 = vld [vmem:[%s3408_s0 + $0x690] sm:$0xff] }
  0x67   :  { %815 = vmatpush.msrb.mxu0 %v254_v0  ;;  %834 = vmatpush.msrb.mxu1 %v287_v1  ;;  %v261_v0 = vld [vmem:[%s3408_s0 + $0x798] sm:$0xff]  ;;  %v194_v1 = vld [vmem:[%s3408_s0 + $0x580] sm:$0xff] }
  0x68   :  { %855 = vmatpush.msrb.mxu2 %v256_v2  ;;  %874 = vmatpush.msrb.mxu3 %v289_v3  ;;  %v227_v2 = vld [vmem:[%s3408_s0 + $0x688] sm:$0xff]  ;;  %v196_v3 = vld [vmem:[%s3408_s0 + $0x590] sm:$0xff] }
  0x69   :  { %816 = vmatpush.msrb.mxu0 %v222_v4  ;;  %835 = vmatpush.msrb.mxu1 %v255_v5  ;;  %v229_v4 = vld [vmem:[%s3408_s0 + $0x698] sm:$0xff]  ;;  %v162_v5 = vld [vmem:[%s3408_s0 + $0x480] sm:$0xff] }
  0x6a   :  { %856 = vmatpush.msrb.mxu2 %v224_v6  ;;  %875 = vmatpush.msrb.mxu3 %v257_v7  ;;  %v195_v6 = vld [vmem:[%s3408_s0 + $0x588] sm:$0xff]  ;;  %v164_v7 = vld [vmem:[%s3408_s0 + $0x490] sm:$0xff] }
  0x6b   :  { %817 = vmatpush.msrb.mxu0 %v190_v8  ;;  %836 = vmatpush.msrb.mxu1 %v223_v9  ;;  %v197_v8 = vld [vmem:[%s3408_s0 + $0x598] sm:$0xff]  ;;  %v130_v9 = vld [vmem:[%s3408_s0 + $0x380] sm:$0xff] }
  0x6c   :  { %857 = vmatpush.msrb.mxu2 %v192_v10  ;;  %876 = vmatpush.msrb.mxu3 %v225_v11  ;;  %v163_v10 = vld [vmem:[%s3408_s0 + $0x488] sm:$0xff]  ;;  %v132_v11 = vld [vmem:[%s3408_s0 + $0x390] sm:$0xff] }
  0x6d   :  { %818 = vmatpush.msrb.mxu0 %v158_v12  ;;  %837 = vmatpush.msrb.mxu1 %v191_v13  ;;  %v165_v12 = vld [vmem:[%s3408_s0 + $0x498] sm:$0xff]  ;;  %v98_v13 = vld [vmem:[%s3408_s0 + $0x280] sm:$0xff] }
  0x6e   :  { %858 = vmatpush.msrb.mxu2 %v160_v14  ;;  %877 = vmatpush.msrb.mxu3 %v193_v15  ;;  %v131_v14 = vld [vmem:[%s3408_s0 + $0x388] sm:$0xff]  ;;  %v100_v15 = vld [vmem:[%s3408_s0 + $0x290] sm:$0xff] }
  0x6f   :  { %819 = vmatpush.msrb.mxu0 %v126_v16  ;;  %838 = vmatpush.msrb.mxu1 %v159_v17  ;;  %v133_v16 = vld [vmem:[%s3408_s0 + $0x398] sm:$0xff]  ;;  %v66_v17 = vld [vmem:[%s3408_s0 + $0x180] sm:$0xff] }
  0x70   :  { %859 = vmatpush.msrb.mxu2 %v128_v18  ;;  %878 = vmatpush.msrb.mxu3 %v161_v19  ;;  %v99_v18 = vld [vmem:[%s3408_s0 + $0x288] sm:$0xff]  ;;  %v68_v19 = vld [vmem:[%s3408_s0 + $0x190] sm:$0xff] }
  0x71   :  { %820 = vmatpush.msrb.mxu0 %v94_v20  ;;  %839 = vmatpush.msrb.mxu1 %v127_v21  ;;  %v101_v20 = vld [vmem:[%s3408_s0 + $0x298] sm:$0xff]  ;;  %v34_v21 = vld [vmem:[%s3408_s0 + $0x80] sm:$0xff] }
  0x72   :  { %860 = vmatpush.msrb.mxu2 %v96_v22  ;;  %879 = vmatpush.msrb.mxu3 %v129_v23  ;;  %v67_v22 = vld [vmem:[%s3408_s0 + $0x188] sm:$0xff]  ;;  %v36_v23 = vld [vmem:[%s3408_s0 + $0x90] sm:$0xff] }
  0x73   :  { %821 = vmatpush.msrb.mxu0 %v62_v24  ;;  %840 = vmatpush.msrb.mxu1 %v95_v25  ;;  %v69_v24 = vld [vmem:[%s3408_s0 + $0x198] sm:$0xff]  ;;  %v454_v25 = vld [vmem:[%s3408_s0 + $0xda0] sm:$0xf] }
  0x74   :  { %861 = vmatpush.msrb.mxu2 %v64_v26  ;;  %880 = vmatpush.msrb.mxu3 %v97_v27  ;;  %v456_v26 = vld [vmem:[%s3408_s0 + $0xdb0] sm:$0xf]  ;;  %v35_v27 = vld [vmem:[%s3408_s0 + $0x88] sm:$0xff] }
  0x75   :  { %822 = vmatpush.msrb.mxu0 %v30_v28  ;;  %841 = vmatpush.msrb.mxu1 %v63_v29  ;;  %v37_v28 = vld [vmem:[%s3408_s0 + $0x98] sm:$0xff]  ;;  %v422_v29 = vld [vmem:[%s3408_s0 + $0xca0] sm:$0xff] }
  0x76   :  { %862 = vmatpush.msrb.mxu2 %v32_v30  ;;  %881 = vmatpush.msrb.mxu3 %v65_v31  ;;  %v455_v30 = vld [vmem:[%s3408_s0 + $0xda8] sm:$0xf]  ;;  %v424_v31 = vld [vmem:[%s3408_s0 + $0xcb0] sm:$0xff] }
  0x77   :  { %1522 = vmatmul.msk.f32.vlgmr.msrb.gmra.mxu0 %vm466_vm1, %v1922_v42  ;;  %1526 = vmatmul.msk.f32.vlgmr.msrb.gmra.mxu2 %vm466_vm1, %v1922_v42 }
  0x78   :  { %1529 = vmatpush.msk.msra.mxu0 %vm470_vm0, %v450_v32  ;;  %1533 = vmatpush.msk.msra.mxu2 %vm470_vm0, %v452_v33  ;;  %v457_v32 = vld [vmem:[%s3408_s0 + $0xdb8] sm:$0xf]  ;;  %v390_v33 = vld [vmem:[%s3408_s0 + $0xba0] sm:$0xff] }
  0x79   :  { %842 = vmatpush.msrb.mxu1 %v31_v34  ;;  %882 = vmatpush.msrb.mxu3 %v33_v35  ;;  %v423_v34 = vld [vmem:[%s3408_s0 + $0xca8] sm:$0xff]  ;;  %v392_v35 = vld [vmem:[%s3408_s0 + $0xbb0] sm:$0xff] }
  0x7a   :  { %1524 = vmatmul.msk.f32.vlgmr.msrb.gmra.mxu1 %vm466_vm1, %v1922_v42  ;;  %1528 = vmatmul.msk.f32.vlgmr.msrb.gmra.mxu3 %vm466_vm1, %v1922_v42 }
  0x7b   :  { %890 = vmatpush.msra.mxu0 %v418_v36  ;;  %1531 = vmatpush.msk.msra.mxu1 %vm470_vm0, %v451_v37  ;;  %v425_v36 = vld [vmem:[%s3408_s0 + $0xcb8] sm:$0xff]  ;;  %v358_v37 = vld [vmem:[%s3408_s0 + $0xaa0] sm:$0xff] }
  0x7c   :  { %930 = vmatpush.msra.mxu2 %v420_v38  ;;  %1535 = vmatpush.msk.msra.mxu3 %vm470_vm0, %v453_v39  ;;  %v391_v38 = vld [vmem:[%s3408_s0 + $0xba8] sm:$0xff]  ;;  %v360_v39 = vld [vmem:[%s3408_s0 + $0xab0] sm:$0xff] }
  0x7d   :  { %891 = vmatpush.msra.mxu0 %v386_v40  ;;  %910 = vmatpush.msra.mxu1 %v419_v41  ;;  %v393_v40 = vld [vmem:[%s3408_s0 + $0xbb8] sm:$0xff]  ;;  %v326_v41 = vld [vmem:[%s3408_s0 + $0x9a0] sm:$0xff] }
  0x7e   :  { %931 = vmatpush.msra.mxu2 %v388_v43  ;;  %950 = vmatpush.msra.mxu3 %v421_v44  ;;  %v359_v43 = vld [vmem:[%s3408_s0 + $0xaa8] sm:$0xff]  ;;  %v328_v44 = vld [vmem:[%s3408_s0 + $0x9b0] sm:$0xff] }
  0x7f   :  { %892 = vmatpush.msra.mxu0 %v354_v45  ;;  %911 = vmatpush.msra.mxu1 %v387_v46  ;;  %v361_v45 = vld [vmem:[%s3408_s0 + $0xab8] sm:$0xff]  ;;  %v294_v46 = vld [vmem:[%s3408_s0 + $0x8a0] sm:$0xff] }
  0x80   :  { %932 = vmatpush.msra.mxu2 %v356_v47  ;;  %951 = vmatpush.msra.mxu3 %v389_v48  ;;  %v327_v47 = vld [vmem:[%s3408_s0 + $0x9a8] sm:$0xff]  ;;  %v296_v48 = vld [vmem:[%s3408_s0 + $0x8b0] sm:$0xff] }
  0x81   :  { %893 = vmatpush.msra.mxu0 %v322_v49  ;;  %912 = vmatpush.msra.mxu1 %v355_v50  ;;  %v329_v49 = vld [vmem:[%s3408_s0 + $0x9b8] sm:$0xff]  ;;  %v262_v50 = vld [vmem:[%s3408_s0 + $0x7a0] sm:$0xff] }
  0x82   :  { %933 = vmatpush.msra.mxu2 %v324_v51  ;;  %952 = vmatpush.msra.mxu3 %v357_v52  ;;  %v295_v51 = vld [vmem:[%s3408_s0 + $0x8a8] sm:$0xff]  ;;  %v264_v52 = vld [vmem:[%s3408_s0 + $0x7b0] sm:$0xff] }
  0x83   :  { %894 = vmatpush.msra.mxu0 %v290_v53  ;;  %913 = vmatpush.msra.mxu1 %v323_v54  ;;  %v297_v53 = vld [vmem:[%s3408_s0 + $0x8b8] sm:$0xff]  ;;  %v230_v54 = vld [vmem:[%s3408_s0 + $0x6a0] sm:$0xff] }
  0x84   :  { %934 = vmatpush.msra.mxu2 %v292_v55  ;;  %953 = vmatpush.msra.mxu3 %v325_v56  ;;  %v263_v55 = vld [vmem:[%s3408_s0 + $0x7a8] sm:$0xff]  ;;  %v232_v56 = vld [vmem:[%s3408_s0 + $0x6b0] sm:$0xff] }
  0x85   :  { %895 = vmatpush.msra.mxu0 %v258_v57  ;;  %914 = vmatpush.msra.mxu1 %v291_v58  ;;  %v265_v57 = vld [vmem:[%s3408_s0 + $0x7b8] sm:$0xff]  ;;  %v198_v58 = vld [vmem:[%s3408_s0 + $0x5a0] sm:$0xff] }
  0x86   :  { %935 = vmatpush.msra.mxu2 %v260_v59  ;;  %954 = vmatpush.msra.mxu3 %v293_v60  ;;  %v231_v59 = vld [vmem:[%s3408_s0 + $0x6a8] sm:$0xff]  ;;  %v200_v60 = vld [vmem:[%s3408_s0 + $0x5b0] sm:$0xff] }
  0x87   :  { %896 = vmatpush.msra.mxu0 %v226_v61  ;;  %915 = vmatpush.msra.mxu1 %v259_v62  ;;  %v233_v61 = vld [vmem:[%s3408_s0 + $0x6b8] sm:$0xff]  ;;  %v166_v62 = vld [vmem:[%s3408_s0 + $0x4a0] sm:$0xff] }
  0x88   :  { %936 = vmatpush.msra.mxu2 %v228_v63  ;;  %955 = vmatpush.msra.mxu3 %v261_v0  ;;  %v199_v63 = vld [vmem:[%s3408_s0 + $0x5a8] sm:$0xff]  ;;  %v168_v0 = vld [vmem:[%s3408_s0 + $0x4b0] sm:$0xff] }
  0x89   :  { %897 = vmatpush.msra.mxu0 %v194_v1  ;;  %916 = vmatpush.msra.mxu1 %v227_v2  ;;  %v201_v1 = vld [vmem:[%s3408_s0 + $0x5b8] sm:$0xff]  ;;  %v134_v2 = vld [vmem:[%s3408_s0 + $0x3a0] sm:$0xff] }
  0x8a   :  { %937 = vmatpush.msra.mxu2 %v196_v3  ;;  %956 = vmatpush.msra.mxu3 %v229_v4  ;;  %v167_v3 = vld [vmem:[%s3408_s0 + $0x4a8] sm:$0xff]  ;;  %v136_v4 = vld [vmem:[%s3408_s0 + $0x3b0] sm:$0xff] }
  0x8b   :  { %898 = vmatpush.msra.mxu0 %v162_v5  ;;  %917 = vmatpush.msra.mxu1 %v195_v6  ;;  %v169_v5 = vld [vmem:[%s3408_s0 + $0x4b8] sm:$0xff]  ;;  %v102_v6 = vld [vmem:[%s3408_s0 + $0x2a0] sm:$0xff] }
  0x8c   :  { %938 = vmatpush.msra.mxu2 %v164_v7  ;;  %957 = vmatpush.msra.mxu3 %v197_v8  ;;  %v135_v7 = vld [vmem:[%s3408_s0 + $0x3a8] sm:$0xff]  ;;  %v104_v8 = vld [vmem:[%s3408_s0 + $0x2b0] sm:$0xff] }
  0x8d   :  { %899 = vmatpush.msra.mxu0 %v130_v9  ;;  %918 = vmatpush.msra.mxu1 %v163_v10  ;;  %v137_v9 = vld [vmem:[%s3408_s0 + $0x3b8] sm:$0xff]  ;;  %v70_v10 = vld [vmem:[%s3408_s0 + $0x1a0] sm:$0xff] }
  0x8e   :  { %939 = vmatpush.msra.mxu2 %v132_v11  ;;  %958 = vmatpush.msra.mxu3 %v165_v12  ;;  %v103_v11 = vld [vmem:[%s3408_s0 + $0x2a8] sm:$0xff]  ;;  %v72_v12 = vld [vmem:[%s3408_s0 + $0x1b0] sm:$0xff] }
  0x8f   :  { %900 = vmatpush.msra.mxu0 %v98_v13  ;;  %919 = vmatpush.msra.mxu1 %v131_v14  ;;  %v105_v13 = vld [vmem:[%s3408_s0 + $0x2b8] sm:$0xff]  ;;  %v38_v14 = vld [vmem:[%s3408_s0 + $0xa0] sm:$0xff] }
  0x90   :  { %940 = vmatpush.msra.mxu2 %v100_v15  ;;  %959 = vmatpush.msra.mxu3 %v133_v16  ;;  %v71_v15 = vld [vmem:[%s3408_s0 + $0x1a8] sm:$0xff]  ;;  %v40_v16 = vld [vmem:[%s3408_s0 + $0xb0] sm:$0xff] }
  0x91   :  { %901 = vmatpush.msra.mxu0 %v66_v17  ;;  %920 = vmatpush.msra.mxu1 %v99_v18  ;;  %v73_v17 = vld [vmem:[%s3408_s0 + $0x1b8] sm:$0xff]  ;;  %v458_v18 = vld [vmem:[%s3408_s0 + $0xdc0] sm:$0xf] }
  0x92   :  { %941 = vmatpush.msra.mxu2 %v68_v19  ;;  %960 = vmatpush.msra.mxu3 %v101_v20  ;;  %v460_v19 = vld [vmem:[%s3408_s0 + $0xdd0] sm:$0xf]  ;;  %v39_v20 = vld [vmem:[%s3408_s0 + $0xa8] sm:$0xff] }
  0x93   :  { %902 = vmatpush.msra.mxu0 %v34_v21  ;;  %921 = vmatpush.msra.mxu1 %v67_v22  ;;  %v41_v21 = vld [vmem:[%s3408_s0 + $0xb8] sm:$0xff]  ;;  %v426_v22 = vld [vmem:[%s3408_s0 + $0xcc0] sm:$0xff] }
  0x94   :  { %942 = vmatpush.msra.mxu2 %v36_v23  ;;  %961 = vmatpush.msra.mxu3 %v69_v24  ;;  %v459_v23 = vld [vmem:[%s3408_s0 + $0xdc8] sm:$0xf]  ;;  %v428_v24 = vld [vmem:[%s3408_s0 + $0xcd0] sm:$0xff] }
  0x95   :  { %1530 = vmatmul.msk.f32.vlgmr.msra.gmra.mxu0 %vm466_vm1, %v1922_v42  ;;  %1534 = vmatmul.msk.f32.vlgmr.msra.gmra.mxu2 %vm466_vm1, %v1922_v42 }
  0x96   :  { %1537 = vmatpush.msk.msrb.mxu0 %vm470_vm0, %v454_v25  ;;  %1541 = vmatpush.msk.msrb.mxu2 %vm470_vm0, %v456_v26  ;;  %v461_v25 = vld [vmem:[%s3408_s0 + $0xdd8] sm:$0xf]  ;;  %v394_v26 = vld [vmem:[%s3408_s0 + $0xbc0] sm:$0xff] }
  0x97   :  { %922 = vmatpush.msra.mxu1 %v35_v27  ;;  %962 = vmatpush.msra.mxu3 %v37_v28  ;;  %v427_v27 = vld [vmem:[%s3408_s0 + $0xcc8] sm:$0xff]  ;;  %v396_v28 = vld [vmem:[%s3408_s0 + $0xbd0] sm:$0xff] }
  0x98   :  { %1532 = vmatmul.msk.f32.vlgmr.msra.gmra.mxu1 %vm466_vm1, %v1922_v42  ;;  %1536 = vmatmul.msk.f32.vlgmr.msra.gmra.mxu3 %vm466_vm1, %v1922_v42 }
  0x99   :  { %970 = vmatpush.msrb.mxu0 %v422_v29  ;;  %1539 = vmatpush.msk.msrb.mxu1 %vm470_vm0, %v455_v30  ;;  %v429_v29 = vld [vmem:[%s3408_s0 + $0xcd8] sm:$0xff]  ;;  %v395_v30 = vld [vmem:[%s3408_s0 + $0xbc8] sm:$0xff] }
  0x9a   :  { %1010 = vmatpush.msrb.mxu2 %v424_v31  ;;  %1543 = vmatpush.msk.msrb.mxu3 %vm470_vm0, %v457_v32  ;;  %v364_v31 = vld [vmem:[%s3408_s0 + $0xad0] sm:$0xff]  ;;  %v397_v32 = vld [vmem:[%s3408_s0 + $0xbd8] sm:$0xff] }
  0x9b   :  { %971 = vmatpush.msrb.mxu0 %v390_v33  ;;  %990 = vmatpush.msrb.mxu1 %v423_v34  ;;  %v330_v33 = vld [vmem:[%s3408_s0 + $0x9c0] sm:$0xff]  ;;  %v363_v34 = vld [vmem:[%s3408_s0 + $0xac8] sm:$0xff] }
  0x9c   :  { %1011 = vmatpush.msrb.mxu2 %v392_v35  ;;  %1030 = vmatpush.msrb.mxu3 %v425_v36  ;;  %v332_v35 = vld [vmem:[%s3408_s0 + $0x9d0] sm:$0xff]  ;;  %v365_v36 = vld [vmem:[%s3408_s0 + $0xad8] sm:$0xff] }
  0x9d   :  { %972 = vmatpush.msrb.mxu0 %v358_v37  ;;  %991 = vmatpush.msrb.mxu1 %v391_v38  ;;  %v298_v37 = vld [vmem:[%s3408_s0 + $0x8c0] sm:$0xff]  ;;  %v331_v38 = vld [vmem:[%s3408_s0 + $0x9c8] sm:$0xff] }
  0x9e   :  { %1012 = vmatpush.msrb.mxu2 %v360_v39  ;;  %1031 = vmatpush.msrb.mxu3 %v393_v40  ;;  %v300_v39 = vld [vmem:[%s3408_s0 + $0x8d0] sm:$0xff]  ;;  %v333_v40 = vld [vmem:[%s3408_s0 + $0x9d8] sm:$0xff] }
  0x9f   :  { %973 = vmatpush.msrb.mxu0 %v326_v41  ;;  %992 = vmatpush.msrb.mxu1 %v359_v43  ;;  %v266_v41 = vld [vmem:[%s3408_s0 + $0x7c0] sm:$0xff]  ;;  %v299_v43 = vld [vmem:[%s3408_s0 + $0x8c8] sm:$0xff] }
  0xa0   :  { %1013 = vmatpush.msrb.mxu2 %v328_v44  ;;  %1032 = vmatpush.msrb.mxu3 %v361_v45  ;;  %v268_v44 = vld [vmem:[%s3408_s0 + $0x7d0] sm:$0xff]  ;;  %v301_v45 = vld [vmem:[%s3408_s0 + $0x8d8] sm:$0xff] }
  0xa1   :  { %974 = vmatpush.msrb.mxu0 %v294_v46  ;;  %993 = vmatpush.msrb.mxu1 %v327_v47  ;;  %v234_v46 = vld [vmem:[%s3408_s0 + $0x6c0] sm:$0xff]  ;;  %v267_v47 = vld [vmem:[%s3408_s0 + $0x7c8] sm:$0xff] }
  0xa2   :  { %1014 = vmatpush.msrb.mxu2 %v296_v48  ;;  %1033 = vmatpush.msrb.mxu3 %v329_v49  ;;  %v236_v48 = vld [vmem:[%s3408_s0 + $0x6d0] sm:$0xff]  ;;  %v269_v49 = vld [vmem:[%s3408_s0 + $0x7d8] sm:$0xff] }
  0xa3   :  { %975 = vmatpush.msrb.mxu0 %v262_v50  ;;  %994 = vmatpush.msrb.mxu1 %v295_v51  ;;  %v202_v50 = vld [vmem:[%s3408_s0 + $0x5c0] sm:$0xff]  ;;  %v235_v51 = vld [vmem:[%s3408_s0 + $0x6c8] sm:$0xff] }
  0xa4   :  { %1015 = vmatpush.msrb.mxu2 %v264_v52  ;;  %1034 = vmatpush.msrb.mxu3 %v297_v53  ;;  %v204_v52 = vld [vmem:[%s3408_s0 + $0x5d0] sm:$0xff]  ;;  %v237_v53 = vld [vmem:[%s3408_s0 + $0x6d8] sm:$0xff] }
  0xa5   :  { %976 = vmatpush.msrb.mxu0 %v230_v54  ;;  %995 = vmatpush.msrb.mxu1 %v263_v55  ;;  %v170_v54 = vld [vmem:[%s3408_s0 + $0x4c0] sm:$0xff]  ;;  %v203_v55 = vld [vmem:[%s3408_s0 + $0x5c8] sm:$0xff] }
  0xa6   :  { %1016 = vmatpush.msrb.mxu2 %v232_v56  ;;  %1035 = vmatpush.msrb.mxu3 %v265_v57  ;;  %v172_v56 = vld [vmem:[%s3408_s0 + $0x4d0] sm:$0xff]  ;;  %v205_v57 = vld [vmem:[%s3408_s0 + $0x5d8] sm:$0xff] }
  0xa7   :  { %977 = vmatpush.msrb.mxu0 %v198_v58  ;;  %996 = vmatpush.msrb.mxu1 %v231_v59  ;;  %v138_v58 = vld [vmem:[%s3408_s0 + $0x3c0] sm:$0xff]  ;;  %v171_v59 = vld [vmem:[%s3408_s0 + $0x4c8] sm:$0xff] }
  0xa8   :  { %1017 = vmatpush.msrb.mxu2 %v200_v60  ;;  %1036 = vmatpush.msrb.mxu3 %v233_v61  ;;  %v140_v60 = vld [vmem:[%s3408_s0 + $0x3d0] sm:$0xff]  ;;  %v173_v61 = vld [vmem:[%s3408_s0 + $0x4d8] sm:$0xff] }
  0xa9   :  { %978 = vmatpush.msrb.mxu0 %v166_v62  ;;  %997 = vmatpush.msrb.mxu1 %v199_v63  ;;  %v106_v62 = vld [vmem:[%s3408_s0 + $0x2c0] sm:$0xff]  ;;  %v139_v63 = vld [vmem:[%s3408_s0 + $0x3c8] sm:$0xff] }
  0xaa   :  { %1018 = vmatpush.msrb.mxu2 %v168_v0  ;;  %1037 = vmatpush.msrb.mxu3 %v201_v1  ;;  %v108_v0 = vld [vmem:[%s3408_s0 + $0x2d0] sm:$0xff]  ;;  %v141_v1 = vld [vmem:[%s3408_s0 + $0x3d8] sm:$0xff] }
  0xab   :  { %979 = vmatpush.msrb.mxu0 %v134_v2  ;;  %998 = vmatpush.msrb.mxu1 %v167_v3  ;;  %v74_v2 = vld [vmem:[%s3408_s0 + $0x1c0] sm:$0xff]  ;;  %v107_v3 = vld [vmem:[%s3408_s0 + $0x2c8] sm:$0xff] }
  0xac   :  { %1019 = vmatpush.msrb.mxu2 %v136_v4  ;;  %1038 = vmatpush.msrb.mxu3 %v169_v5  ;;  %v76_v4 = vld [vmem:[%s3408_s0 + $0x1d0] sm:$0xff]  ;;  %v109_v5 = vld [vmem:[%s3408_s0 + $0x2d8] sm:$0xff] }
  0xad   :  { %980 = vmatpush.msrb.mxu0 %v102_v6  ;;  %999 = vmatpush.msrb.mxu1 %v135_v7  ;;  %v42_v6 = vld [vmem:[%s3408_s0 + $0xc0] sm:$0xff]  ;;  %v75_v7 = vld [vmem:[%s3408_s0 + $0x1c8] sm:$0xff] }
  0xae   :  { %1020 = vmatpush.msrb.mxu2 %v104_v8  ;;  %1039 = vmatpush.msrb.mxu3 %v137_v9  ;;  %v44_v8 = vld [vmem:[%s3408_s0 + $0xd0] sm:$0xff]  ;;  %v77_v9 = vld [vmem:[%s3408_s0 + $0x1d8] sm:$0xff] }
  0xaf   :  { %981 = vmatpush.msrb.mxu0 %v70_v10  ;;  %1000 = vmatpush.msrb.mxu1 %v103_v11  ;;  %v462_v10 = vld [vmem:[%s3408_s0 + $0xde0] sm:$0xf]  ;;  %v464_v11 = vld [vmem:[%s3408_s0 + $0xdf0] sm:$0xf] }
  0xb0   :  { %1021 = vmatpush.msrb.mxu2 %v72_v12  ;;  %1040 = vmatpush.msrb.mxu3 %v105_v13  ;;  %v43_v12 = vld [vmem:[%s3408_s0 + $0xc8] sm:$0xff]  ;;  %v45_v13 = vld [vmem:[%s3408_s0 + $0xd8] sm:$0xff] }
  0xb1   :  { %982 = vmatpush.msrb.mxu0 %v38_v14  ;;  %1001 = vmatpush.msrb.mxu1 %v71_v15  ;;  %v2859_v14 = vld [vmem:[%s3409_s1] sm:$0xff] }
  0xb2   :  { %1022 = vmatpush.msrb.mxu2 %v40_v16  ;;  %1041 = vmatpush.msrb.mxu3 %v73_v17  ;;  %v430_v15 = vld [vmem:[%s3408_s0 + $0xce0] sm:$0xff]  ;;  %v463_v16 = vld [vmem:[%s3408_s0 + $0xde8] sm:$0xf]  ;;  %v432_v17 = vld [vmem:[%s3408_s0 + $0xcf0] sm:$0xff] }
  0xb3   :  { %1538 = vmatmul.msk.f32.vlgmr.msrb.gmra.mxu0 %vm466_vm1, %v1922_v42  ;;  %1542 = vmatmul.msk.f32.vlgmr.msrb.gmra.mxu2 %vm466_vm1, %v1922_v42 }
  0xb4   :  { %1545 = vmatpush.msk.msra.mxu0 %vm470_vm0, %v458_v18  ;;  %1549 = vmatpush.msk.msra.mxu2 %vm470_vm0, %v460_v19  ;;  %v465_v18 = vld [vmem:[%s3408_s0 + $0xdf8] sm:$0xf]  ;;  %v398_v19 = vld [vmem:[%s3408_s0 + $0xbe0] sm:$0xff] }
  0xb5   :  { %1002 = vmatpush.msrb.mxu1 %v39_v20  ;;  %1042 = vmatpush.msrb.mxu3 %v41_v21  ;;  %v431_v20 = vld [vmem:[%s3408_s0 + $0xce8] sm:$0xff]  ;;  %v400_v21 = vld [vmem:[%s3408_s0 + $0xbf0] sm:$0xff] }
  0xb6   :  { %1540 = vmatmul.msk.f32.vlgmr.msrb.gmra.mxu1 %vm466_vm1, %v1922_v42  ;;  %1544 = vmatmul.msk.f32.vlgmr.msrb.gmra.mxu3 %vm466_vm1, %v1922_v42  ;;  %v362_v42 = vld [vmem:[%s3408_s0 + $0xac0] sm:$0xff] }
  0xb7   :  { %1050 = vmatpush.msra.mxu0 %v426_v22  ;;  %1547 = vmatpush.msk.msra.mxu1 %vm470_vm0, %v459_v23  ;;  %v433_v22 = vld [vmem:[%s3408_s0 + $0xcf8] sm:$0xff]  ;;  %v366_v23 = vld [vmem:[%s3408_s0 + $0xae0] sm:$0xff] }
  0xb8   :  { %1090 = vmatpush.msra.mxu2 %v428_v24  ;;  %1551 = vmatpush.msk.msra.mxu3 %vm470_vm0, %v461_v25  ;;  %v399_v24 = vld [vmem:[%s3408_s0 + $0xbe8] sm:$0xff]  ;;  %v368_v25 = vld [vmem:[%s3408_s0 + $0xaf0] sm:$0xff] }
  0xb9   :  { %1051 = vmatpush.msra.mxu0 %v394_v26  ;;  %1070 = vmatpush.msra.mxu1 %v427_v27  ;;  %v401_v26 = vld [vmem:[%s3408_s0 + $0xbf8] sm:$0xff]  ;;  %v334_v27 = vld [vmem:[%s3408_s0 + $0x9e0] sm:$0xff] }
  0xba   :  { %1091 = vmatpush.msra.mxu2 %v396_v28  ;;  %1110 = vmatpush.msra.mxu3 %v429_v29  ;;  %v367_v28 = vld [vmem:[%s3408_s0 + $0xae8] sm:$0xff]  ;;  %v336_v29 = vld [vmem:[%s3408_s0 + $0x9f0] sm:$0xff] }
  0xbb   :  { %1052 = vmatpush.msra.mxu0 %v362_v42  ;;  %1071 = vmatpush.msra.mxu1 %v395_v30  ;;  %v369_v42 = vld [vmem:[%s3408_s0 + $0xaf8] sm:$0xff]  ;;  %v302_v30 = vld [vmem:[%s3408_s0 + $0x8e0] sm:$0xff] }
  0xbc   :  { %1092 = vmatpush.msra.mxu2 %v364_v31  ;;  %1111 = vmatpush.msra.mxu3 %v397_v32  ;;  %v335_v31 = vld [vmem:[%s3408_s0 + $0x9e8] sm:$0xff]  ;;  %v304_v32 = vld [vmem:[%s3408_s0 + $0x8f0] sm:$0xff] }
  0xbd   :  { %1053 = vmatpush.msra.mxu0 %v330_v33  ;;  %1072 = vmatpush.msra.mxu1 %v363_v34  ;;  %v337_v33 = vld [vmem:[%s3408_s0 + $0x9f8] sm:$0xff]  ;;  %v270_v34 = vld [vmem:[%s3408_s0 + $0x7e0] sm:$0xff] }
  0xbe   :  { %1093 = vmatpush.msra.mxu2 %v332_v35  ;;  %1112 = vmatpush.msra.mxu3 %v365_v36  ;;  %v303_v35 = vld [vmem:[%s3408_s0 + $0x8e8] sm:$0xff]  ;;  %v272_v36 = vld [vmem:[%s3408_s0 + $0x7f0] sm:$0xff] }
  0xbf   :  { %1054 = vmatpush.msra.mxu0 %v298_v37  ;;  %1073 = vmatpush.msra.mxu1 %v331_v38  ;;  %v305_v37 = vld [vmem:[%s3408_s0 + $0x8f8] sm:$0xff]  ;;  %v238_v38 = vld [vmem:[%s3408_s0 + $0x6e0] sm:$0xff] }
  0xc0   :  { %1094 = vmatpush.msra.mxu2 %v300_v39  ;;  %1113 = vmatpush.msra.mxu3 %v333_v40  ;;  %v271_v39 = vld [vmem:[%s3408_s0 + $0x7e8] sm:$0xff]  ;;  %v240_v40 = vld [vmem:[%s3408_s0 + $0x6f0] sm:$0xff] }
  0xc1   :  { %1055 = vmatpush.msra.mxu0 %v266_v41  ;;  %1074 = vmatpush.msra.mxu1 %v299_v43  ;;  %v273_v41 = vld [vmem:[%s3408_s0 + $0x7f8] sm:$0xff]  ;;  %v206_v43 = vld [vmem:[%s3408_s0 + $0x5e0] sm:$0xff] }
  0xc2   :  { %1095 = vmatpush.msra.mxu2 %v268_v44  ;;  %1114 = vmatpush.msra.mxu3 %v301_v45  ;;  %v239_v44 = vld [vmem:[%s3408_s0 + $0x6e8] sm:$0xff]  ;;  %v208_v45 = vld [vmem:[%s3408_s0 + $0x5f0] sm:$0xff] }
  0xc3   :  { %1056 = vmatpush.msra.mxu0 %v234_v46  ;;  %1075 = vmatpush.msra.mxu1 %v267_v47  ;;  %v241_v46 = vld [vmem:[%s3408_s0 + $0x6f8] sm:$0xff]  ;;  %v174_v47 = vld [vmem:[%s3408_s0 + $0x4e0] sm:$0xff] }
  0xc4   :  { %1096 = vmatpush.msra.mxu2 %v236_v48  ;;  %1115 = vmatpush.msra.mxu3 %v269_v49  ;;  %v207_v48 = vld [vmem:[%s3408_s0 + $0x5e8] sm:$0xff]  ;;  %v176_v49 = vld [vmem:[%s3408_s0 + $0x4f0] sm:$0xff] }
  0xc5   :  { %1057 = vmatpush.msra.mxu0 %v202_v50  ;;  %1076 = vmatpush.msra.mxu1 %v235_v51  ;;  %v209_v50 = vld [vmem:[%s3408_s0 + $0x5f8] sm:$0xff]  ;;  %v142_v51 = vld [vmem:[%s3408_s0 + $0x3e0] sm:$0xff] }
  0xc6   :  { %1097 = vmatpush.msra.mxu2 %v204_v52  ;;  %1116 = vmatpush.msra.mxu3 %v237_v53  ;;  %v175_v52 = vld [vmem:[%s3408_s0 + $0x4e8] sm:$0xff]  ;;  %v144_v53 = vld [vmem:[%s3408_s0 + $0x3f0] sm:$0xff] }
  0xc7   :  { %1058 = vmatpush.msra.mxu0 %v170_v54  ;;  %1077 = vmatpush.msra.mxu1 %v203_v55  ;;  %v177_v54 = vld [vmem:[%s3408_s0 + $0x4f8] sm:$0xff]  ;;  %v110_v55 = vld [vmem:[%s3408_s0 + $0x2e0] sm:$0xff] }
  0xc8   :  { %1098 = vmatpush.msra.mxu2 %v172_v56  ;;  %1117 = vmatpush.msra.mxu3 %v205_v57  ;;  %v143_v56 = vld [vmem:[%s3408_s0 + $0x3e8] sm:$0xff]  ;;  %v112_v57 = vld [vmem:[%s3408_s0 + $0x2f0] sm:$0xff] }
  0xc9   :  { %1059 = vmatpush.msra.mxu0 %v138_v58  ;;  %1078 = vmatpush.msra.mxu1 %v171_v59  ;;  %v145_v58 = vld [vmem:[%s3408_s0 + $0x3f8] sm:$0xff]  ;;  %v78_v59 = vld [vmem:[%s3408_s0 + $0x1e0] sm:$0xff] }
  0xca   :  { %1099 = vmatpush.msra.mxu2 %v140_v60  ;;  %1118 = vmatpush.msra.mxu3 %v173_v61  ;;  %v111_v60 = vld [vmem:[%s3408_s0 + $0x2e8] sm:$0xff]  ;;  %v80_v61 = vld [vmem:[%s3408_s0 + $0x1f0] sm:$0xff] }
  0xcb   :  { %1060 = vmatpush.msra.mxu0 %v106_v62  ;;  %1079 = vmatpush.msra.mxu1 %v139_v63  ;;  %v113_v62 = vld [vmem:[%s3408_s0 + $0x2f8] sm:$0xff]  ;;  %v46_v63 = vld [vmem:[%s3408_s0 + $0xe0] sm:$0xff] }
  0xcc   :  { %1100 = vmatpush.msra.mxu2 %v108_v0  ;;  %1119 = vmatpush.msra.mxu3 %v141_v1  ;;  %v79_v0 = vld [vmem:[%s3408_s0 + $0x1e8] sm:$0xff]  ;;  %v48_v1 = vld [vmem:[%s3408_s0 + $0xf0] sm:$0xff] }
  0xcd   :  { %1061 = vmatpush.msra.mxu0 %v74_v2  ;;  %1080 = vmatpush.msra.mxu1 %v107_v3  ;;  %v81_v2 = vld [vmem:[%s3408_s0 + $0x1f8] sm:$0xff]  ;;  %v47_v3 = vld [vmem:[%s3408_s0 + $0xe8] sm:$0xff] }
  0xce   :  { %1101 = vmatpush.msra.mxu2 %v76_v4  ;;  %1120 = vmatpush.msra.mxu3 %v109_v5  ;;  %v49_v4 = vld [vmem:[%s3408_s0 + $0xf8] sm:$0xff]  ;;  %v3043_v5 = vpop.f32.mrf.mxu1 }
  0xcf   :  { %1062 = vmatpush.msra.mxu0 %v42_v6  ;;  %1081 = vmatpush.msra.mxu1 %v75_v7  ;;  %v3045_v6 = vpop.f32.mrf.mxu0 }
  0xd0   :  { %1102 = vmatpush.msra.mxu2 %v44_v8  ;;  %1121 = vmatpush.msra.mxu3 %v77_v9  ;;  %v1207_v7 = vadd.f32 %v3043_v5, %v3045_v6  ;;  %v3049_v8 = vpop.f32.mrf.mxu2 }
  0xd1   :  { %1546 = vmatmul.msk.f32.vlgmr.msra.gmra.mxu0 %vm466_vm1, %v2859_v14  ;;  %1550 = vmatmul.msk.f32.vlgmr.msra.gmra.mxu2 %vm466_vm1, %v2859_v14 }
  0xd2   :  { %1553 = vmatpush.msk.msrb.mxu0 %vm470_vm0, %v462_v10  ;;  %1557 = vmatpush.msk.msrb.mxu2 %vm470_vm0, %v464_v11  ;;  %v1208_v9 = vadd.f32 %v1207_v7, %v3049_v8  ;;  %v3052_v10 = vpop.f32.mrf.mxu3 }
  0xd3   :  { %1082 = vmatpush.msra.mxu1 %v43_v12  ;;  %1122 = vmatpush.msra.mxu3 %v45_v13 }
  0xd4   :  { %1548 = vmatmul.msk.f32.vlgmr.msra.gmra.mxu1 %vm466_vm1, %v2859_v14  ;;  %1552 = vmatmul.msk.f32.vlgmr.msra.gmra.mxu3 %vm466_vm1, %v2859_v14  ;;  %v1209_v11 = vadd.f32 %v1208_v9, %v3052_v10 }
  0xd5   :  { %1130 = vmatpush.msrb.mxu0 %v430_v15  ;;  %1555 = vmatpush.msk.msrb.mxu1 %vm470_vm0, %v463_v16 }
  0xd6   :  { %1170 = vmatpush.msrb.mxu2 %v432_v17  ;;  %1559 = vmatpush.msk.msrb.mxu3 %vm470_vm0, %v465_v18 }
  0xd7   :  { %1131 = vmatpush.msrb.mxu0 %v398_v19  ;;  %1150 = vmatpush.msrb.mxu1 %v431_v20  ;;  %v3055_v12 = vpop.f32.mrf.mxu0 }
  0xd8   :  { %1171 = vmatpush.msrb.mxu2 %v400_v21  ;;  %1190 = vmatpush.msrb.mxu3 %v433_v22  ;;  %v1210_v13 = vadd.f32 %v1209_v11, %v3055_v12  ;;  %v3061_v16 = vpop.f32.mrf.mxu2 }
  0xd9   :  { %1132 = vmatpush.msrb.mxu0 %v366_v23  ;;  %1151 = vmatpush.msrb.mxu1 %v399_v24 }
  0xda   :  { %1172 = vmatpush.msrb.mxu2 %v368_v25  ;;  %1191 = vmatpush.msrb.mxu3 %v401_v26  ;;  %v3064_v18 = vpop.f32.mrf.mxu3 }
  0xdb   :  { %1133 = vmatpush.msrb.mxu0 %v334_v27  ;;  %1152 = vmatpush.msrb.mxu1 %v367_v28 }
  0xdc   :  { %1173 = vmatpush.msrb.mxu2 %v336_v29  ;;  %1192 = vmatpush.msrb.mxu3 %v369_v42 }
  0xdd   :  { %1134 = vmatpush.msrb.mxu0 %v302_v30  ;;  %1153 = vmatpush.msrb.mxu1 %v335_v31 }
  0xde   :  { %1174 = vmatpush.msrb.mxu2 %v304_v32  ;;  %1193 = vmatpush.msrb.mxu3 %v337_v33 }
  0xdf   :  { %1135 = vmatpush.msrb.mxu0 %v270_v34  ;;  %1154 = vmatpush.msrb.mxu1 %v303_v35  ;;  %v3066_v19 = vpop.f32.mrf.mxu0 }
  0xe0   :  { %1175 = vmatpush.msrb.mxu2 %v272_v36  ;;  %1194 = vmatpush.msrb.mxu3 %v305_v37  ;;  %v3072_v23 = vpop.f32.mrf.mxu2 }
  0xe1   :  { %1136 = vmatpush.msrb.mxu0 %v238_v38  ;;  %1155 = vmatpush.msrb.mxu1 %v271_v39 }
  0xe2   :  { %1176 = vmatpush.msrb.mxu2 %v240_v40  ;;  %1195 = vmatpush.msrb.mxu3 %v273_v41  ;;  %v3076_v26 = vpop.f32.mrf.mxu3 }
  0xe3   :  { %1137 = vmatpush.msrb.mxu0 %v206_v43  ;;  %1156 = vmatpush.msrb.mxu1 %v239_v44 }
  0xe4   :  { %1177 = vmatpush.msrb.mxu2 %v208_v45  ;;  %1196 = vmatpush.msrb.mxu3 %v241_v46 }
  0xe5   :  { %1138 = vmatpush.msrb.mxu0 %v174_v47  ;;  %1157 = vmatpush.msrb.mxu1 %v207_v48 }
  0xe6   :  { %1178 = vmatpush.msrb.mxu2 %v176_v49  ;;  %1197 = vmatpush.msrb.mxu3 %v209_v50 }
  0xe7   :  { %1139 = vmatpush.msrb.mxu0 %v142_v51  ;;  %1158 = vmatpush.msrb.mxu1 %v175_v52 }
  0xe8   :  { %1179 = vmatpush.msrb.mxu2 %v144_v53  ;;  %1198 = vmatpush.msrb.mxu3 %v177_v54 }
  0xe9   :  { %1140 = vmatpush.msrb.mxu0 %v110_v55  ;;  %1159 = vmatpush.msrb.mxu1 %v143_v56 }
  0xea   :  { %1180 = vmatpush.msrb.mxu2 %v112_v57  ;;  %1199 = vmatpush.msrb.mxu3 %v145_v58 }
  0xeb   :  { %1141 = vmatpush.msrb.mxu0 %v78_v59  ;;  %1160 = vmatpush.msrb.mxu1 %v111_v60 }
  0xec   :  { %1181 = vmatpush.msrb.mxu2 %v80_v61  ;;  %1200 = vmatpush.msrb.mxu3 %v113_v62 }
  0xed   :  { %1142 = vmatpush.msrb.mxu0 %v46_v63  ;;  %1161 = vmatpush.msrb.mxu1 %v79_v0 }
  0xee   :  { %1182 = vmatpush.msrb.mxu2 %v48_v1  ;;  %1201 = vmatpush.msrb.mxu3 %v81_v2 }
  0xef   :  { %1554 = vmatmul.msk.f32.vlgmr.msrb.gmra.mxu0 %vm466_vm1, %v2859_v14  ;;  %1558 = vmatmul.msk.f32.vlgmr.msrb.gmra.mxu2 %vm466_vm1, %v2859_v14 }
  0xf0   :  { %1162 = vmatpush.msrb.mxu1 %v47_v3  ;;  %1202 = vmatpush.msrb.mxu3 %v49_v4 }
  0xf1   :  { %1556 = vmatmul.msk.f32.vlgmr.msrb.gmra.mxu1 %vm466_vm1, %v2859_v14  ;;  %1560 = vmatmul.msk.f32.vlgmr.msrb.gmra.mxu3 %vm466_vm1, %v2859_v14  ;;  %v3058_v14 = vpop.f32.mrf.mxu1 }
  0xf2   :  { %v1211_v15 = vadd.f32 %v1210_v13, %v3058_v14 }
  0xf4   :  { %v1212_v17 = vadd.f32 %v1211_v15, %v3061_v16  ;;  %v3078_v27 = vpop.f32.mrf.mxu0 }
  0xf6   :  { %v1213_v20 = vadd.f32 %v1212_v17, %v3064_v18 }
  0xf8   :  { %v1214_v21 = vadd.f32 %v1213_v20, %v3066_v19 }
  0xf9   :  { %v3070_v22 = vpop.f32.mrf.mxu1 }
  0xfa   :  { %v1215_v24 = vadd.f32 %v1214_v21, %v3070_v22  ;;  %v3084_v30 = vpop.f32.mrf.mxu2 }
  0xfc   :  { %v1216_v25 = vadd.f32 %v1215_v24, %v3072_v23 }
  0xfd   :  { %v3088_v33 = vpop.f32.mrf.mxu3 }
  0xfe   :  { %v1217_v28 = vadd.f32 %v1216_v25, %v3076_v26 }
 0x100   :  { %v1218_v29 = vadd.f32 %v1217_v28, %v3078_v27 }
 0x101   :  { %v3082_v42 = vpop.f32.mrf.mxu1 }
 0x102   :  { %v1219_v31 = vadd.f32 %v1218_v29, %v3082_v42 }
 0x104   :  { %v1220_v32 = vadd.f32 %v1219_v31, %v3084_v30 }
 0x106   :  { %v1221_v35 = vadd.f32 %v1220_v32, %v3088_v33 }
 0x112   :  { %v3090_v34 = vpop.f32.mrf.mxu0 }
 0x113   :  { %v1222_v36 = vadd.f32 %v1221_v35, %v3090_v34 }
 0x115   :  { %v3094_v37 = vpop.f32.mrf.mxu1 }
 0x116   :  { %v1223_v39 = vadd.f32 %v1222_v36, %v3094_v37 }
 0x118   :  { %v3096_v38 = vpop.f32.mrf.mxu2 }
 0x119   :  { %v1224_v40 = vadd.f32 %v1223_v39, %v3096_v38 }
 0x11b   :  { %v3100_v41 = vpop.f32.mrf.mxu3 }
 0x11c   :  { %v1225_v44 = vadd.f32 %v1224_v40, %v3100_v41 }
 0x130   :  { %v3102_v43 = vpop.f32.mrf.mxu0 }
 0x131   :  { %v1226_v45 = vadd.f32 %v1225_v44, %v3102_v43 }
 0x133   :  { %v3106_v46 = vpop.f32.mrf.mxu1 }
 0x134   :  { %v1227_v48 = vadd.f32 %v1226_v45, %v3106_v46 }
 0x136   :  { %v3108_v47 = vpop.f32.mrf.mxu2 }
 0x137   :  { %v1228_v49 = vadd.f32 %v1227_v48, %v3108_v47 }
 0x139   :  { %v3112_v50 = vpop.f32.mrf.mxu3 }
 0x13a   :  { %v1229_v52 = vadd.f32 %v1228_v49, %v3112_v50 }
 0x14e   :  { %v3114_v51 = vpop.f32.mrf.mxu0 }
 0x14f   :  { %v1230_v53 = vadd.f32 %v1229_v52, %v3114_v51 }
 0x151   :  { %v3118_v54 = vpop.f32.mrf.mxu1 }
 0x152   :  { %v1231_v56 = vadd.f32 %v1230_v53, %v3118_v54 }
 0x154   :  { %v3120_v55 = vpop.f32.mrf.mxu2 }
 0x155   :  { %v1232_v57 = vadd.f32 %v1231_v56, %v3120_v55 }
 0x157   :  { %v3124_v58 = vpop.f32.mrf.mxu3 }
 0x158   :  { %v1233_v59 = vadd.f32 %v1232_v57, %v3124_v58 }
 0x16c   :  { %v3127_v60 = vpop.f32.mrf.mxu0 }
 0x16d   :  { %v1234_v61 = vadd.f32 %v1233_v59, %v3127_v60 }
 0x16e   :  { %v3130_v62 = vpop.f32.mrf.mxu1 }
 0x16f   :  { %v1235_v63 = vadd.f32 %v1234_v61, %v3130_v62 }
 0x172   :  { %v3133_v0 = vpop.f32.mrf.mxu2 }
 0x173   :  { %v1236_v1 = vadd.f32 %v1235_v63, %v3133_v0 }
 0x174   :  { %v3136_v2 = vpop.f32.mrf.mxu3 }
 0x175   :  { %v1237_v3 = vadd.f32 %v1236_v1, %v3136_v2 }
 0x177   :  { %1238 = vadd.xlane.f32.xlu0 %v1237_v3 }
 0x1ea   :  { %v1239_v4 = vpop.xlane.xlu0 %1238 }
 0x1eb   :  { %v3139_v7 = vmul.f32 0.00024414063, %v1239_v4 }
 0x1ed   :  { %v1241_v9 = vsub.f32 %v3045_v6, %v3139_v7  ;;  %v1242_v11 = vsub.f32 %v3043_v5, %v3139_v7  ;;  %v1243_v13 = vsub.f32 %v3049_v8, %v3139_v7  ;;  %v1244_v20 = vsub.f32 %v3052_v10, %v3139_v7 }
 0x1ee   :  { %v1245_v21 = vsub.f32 %v3055_v12, %v3139_v7  ;;  %v1246_v28 = vsub.f32 %v3058_v14, %v3139_v7  ;;  %v1247_v32 = vsub.f32 %v3061_v16, %v3139_v7  ;;  %v1248_v39 = vsub.f32 %v3064_v18, %v3139_v7 }
 0x1ef   :  { %v1273_v15 = vmul.f32 %v1241_v9, %v1241_v9  ;;  %v1274_v17 = vmul.f32 %v1242_v11, %v1242_v11  ;;  %v1275_v24 = vmul.f32 %v1243_v13, %v1243_v13  ;;  %v1276_v29 = vmul.f32 %v1244_v20, %v1244_v20 }
 0x1f0   :  { %v1277_v35 = vmul.f32 %v1245_v21, %v1245_v21  ;;  %v1278_v40 = vmul.f32 %v1246_v28, %v1246_v28  ;;  %v1249_v45 = vsub.f32 %v3066_v19, %v3139_v7  ;;  %v1279_v48 = vmul.f32 %v1247_v32, %v1247_v32 }
 0x1f1   :  { %v1305_v25 = vadd.f32 %v1274_v17, %v1273_v15  ;;  %v1250_v52 = vsub.f32 %v3070_v22, %v3139_v7  ;;  %v1280_v53 = vmul.f32 %v1248_v39, %v1248_v39  ;;  %v1251_v57 = vsub.f32 %v3072_v23, %v3139_v7 }
 0x1f2   :  { %v1281_v59 = vmul.f32 %v1249_v45, %v1249_v45  ;;  %v1252_v63 = vsub.f32 %v3076_v26, %v3139_v7  ;;  %v1253_v4 = vsub.f32 %v3078_v27, %v3139_v7  ;;  %v1254_v13 = vsub.f32 %v3082_v42, %v3139_v7 }
 0x1f3   :  { %v1306_v31 = vadd.f32 %v1305_v25, %v1275_v24  ;;  %v1282_v1 = vmul.f32 %v1250_v52, %v1250_v52  ;;  %v1283_v9 = vmul.f32 %v1251_v57, %v1251_v57  ;;  %v1255_v20 = vsub.f32 %v3084_v30, %v3139_v7 }
 0x1f4   :  { %v1284_v15 = vmul.f32 %v1252_v63, %v1252_v63  ;;  %v1285_v21 = vmul.f32 %v1253_v4, %v1253_v4  ;;  %v1256_v25 = vsub.f32 %v3088_v33, %v3139_v7  ;;  %v1286_v28 = vmul.f32 %v1254_v13, %v1254_v13 }
 0x1f5   :  { %v1307_v36 = vadd.f32 %v1306_v31, %v1276_v29  ;;  %v1257_v31 = vsub.f32 %v3090_v34, %v3139_v7  ;;  %v1287_v32 = vmul.f32 %v1255_v20, %v1255_v20 }
 0x1f6   :  { %v1288_v39 = vmul.f32 %v1256_v25, %v1256_v25 }
 0x1f7   :  { %v1308_v44 = vadd.f32 %v1307_v36, %v1277_v35  ;;  %v1258_v36 = vsub.f32 %v3094_v37, %v3139_v7  ;;  %v1289_v45 = vmul.f32 %v1257_v31, %v1257_v31 }
 0x1f9   :  { %v1309_v49 = vadd.f32 %v1308_v44, %v1278_v40  ;;  %v1259_v44 = vsub.f32 %v3096_v38, %v3139_v7  ;;  %v1290_v52 = vmul.f32 %v1258_v36, %v1258_v36 }
 0x1fb   :  { %v1310_v56 = vadd.f32 %v1309_v49, %v1279_v48  ;;  %v1260_v49 = vsub.f32 %v3100_v41, %v3139_v7  ;;  %v1291_v57 = vmul.f32 %v1259_v44, %v1259_v44 }
 0x1fd   :  { %v1311_v61 = vadd.f32 %v1310_v56, %v1280_v53  ;;  %v1261_v56 = vsub.f32 %v3102_v43, %v3139_v7  ;;  %v1292_v63 = vmul.f32 %v1260_v49, %v1260_v49 }
 0x1ff   :  { %v1312_v3 = vadd.f32 %v1311_v61, %v1281_v59  ;;  %v1262_v61 = vsub.f32 %v3106_v46, %v3139_v7  ;;  %v1293_v4 = vmul.f32 %v1261_v56, %v1261_v56 }
 0x201   :  { %v1313_v11 = vadd.f32 %v1312_v3, %v1282_v1  ;;  %v1263_v3 = vsub.f32 %v3108_v47, %v3139_v7  ;;  %v1294_v13 = vmul.f32 %v1262_v61, %v1262_v61 }
 0x203   :  { %v1314_v17 = vadd.f32 %v1313_v11, %v1283_v9  ;;  %v1264_v11 = vsub.f32 %v3112_v50, %v3139_v7  ;;  %v1295_v20 = vmul.f32 %v1263_v3, %v1263_v3 }
 0x205   :  { %v1315_v24 = vadd.f32 %v1314_v17, %v1284_v15  ;;  %v1265_v17 = vsub.f32 %v3114_v51, %v3139_v7  ;;  %v1296_v25 = vmul.f32 %v1264_v11, %v1264_v11 }
 0x207   :  { %v1316_v29 = vadd.f32 %v1315_v24, %v1285_v21  ;;  %v1266_v24 = vsub.f32 %v3118_v54, %v3139_v7  ;;  %v1297_v31 = vmul.f32 %v1265_v17, %v1265_v17 }
 0x209   :  { %v1317_v35 = vadd.f32 %v1316_v29, %v1286_v28  ;;  %v1267_v29 = vsub.f32 %v3120_v55, %v3139_v7  ;;  %v1298_v36 = vmul.f32 %v1266_v24, %v1266_v24 }
 0x20b   :  { %v1318_v40 = vadd.f32 %v1317_v35, %v1287_v32  ;;  %v1268_v35 = vsub.f32 %v3124_v58, %v3139_v7  ;;  %v1299_v44 = vmul.f32 %v1267_v29, %v1267_v29 }
 0x20d   :  { %v1319_v48 = vadd.f32 %v1318_v40, %v1288_v39  ;;  %v1269_v40 = vsub.f32 %v3127_v60, %v3139_v7  ;;  %v1300_v49 = vmul.f32 %v1268_v35, %v1268_v35 }
 0x20f   :  { %v1320_v53 = vadd.f32 %v1319_v48, %v1289_v45  ;;  %v1270_v48 = vsub.f32 %v3130_v62, %v3139_v7  ;;  %v1301_v56 = vmul.f32 %v1269_v40, %v1269_v40  ;;  %v1352_v40 = vld [vmem:[%s3411_s3] sm:$0xff] }
 0x211   :  { %v1321_v59 = vadd.f32 %v1320_v53, %v1290_v52  ;;  %v1271_v53 = vsub.f32 %v3133_v0, %v3139_v7  ;;  %v1302_v61 = vmul.f32 %v1270_v48, %v1270_v48 }
 0x213   :  { %v1322_v1 = vadd.f32 %v1321_v59, %v1291_v57  ;;  %v1272_v59 = vsub.f32 %v3136_v2, %v3139_v7 }
 0x215   :  { %v1323_v9 = vadd.f32 %v1322_v1, %v1292_v63  ;;  %v1303_v1 = vmul.f32 %v1271_v53, %v1271_v53 }
 0x217   :  { %v1324_v15 = vadd.f32 %v1323_v9, %v1293_v4  ;;  %v1304_v4 = vmul.f32 %v1272_v59, %v1272_v59 }
 0x219   :  { %v1325_v21 = vadd.f32 %v1324_v15, %v1294_v13  ;;  %v1567_v13 = vmov 0  }
 0x21a   :  { %1562 = vset.pattern.permute.xlu1 %v1567_v13  ;;  %1563 = vset.pattern.permute.xlu0 %v1567_v13 }
 0x21b   :  { %v1326_v28 = vadd.f32 %v1325_v21, %v1295_v20 }
 0x21d   :  { %v1327_v32 = vadd.f32 %v1326_v28, %v1296_v25 }
 0x21f   :  { %v1328_v39 = vadd.f32 %v1327_v32, %v1297_v31  ;;  %v1339_v31 = vld [vmem:[%s3410_s2] sm:$0xff] }
 0x221   :  { %v1329_v45 = vadd.f32 %v1328_v39, %v1298_v36 }
 0x223   :  { %v1330_v52 = vadd.f32 %v1329_v45, %v1299_v44 }
 0x225   :  { %v1331_v57 = vadd.f32 %v1330_v52, %v1300_v49 }
 0x227   :  { %v1332_v63 = vadd.f32 %v1331_v57, %v1301_v56 }
 0x229   :  { %v1333_v3 = vadd.f32 %v1332_v63, %v1302_v61 }
 0x22b   :  { %v1334_v9 = vadd.f32 %v1333_v3, %v1303_v1 }
 0x22d   :  { %v1335_v11 = vadd.f32 %v1334_v9, %v1304_v4 }
 0x22f   :  { %1336 = vadd.xlane.f32.xlu0 %v1335_v11 }
 0x2a2   :  { %v1337_v15 = vpop.xlane.xlu0 %1336 }
 0x2a3   :  { %v1338_v17 = vmul.f32 0.00024414063, %v1337_v15 }
 0x2a5   :  { %v1340_v20 = vadd.f32 1e-05, %v1338_v17 }
 0x2a7   :  { %1564 = vrsqrt.f32 %v1340_v20  ;;  %vm1347_vm3 = vweird.f32 %v1340_v20 }
 0x2ad   :  { %v1565_v21 = vpop.eup %1564 }
 0x2ae   :  { %v1342_v24 = vmul.f32 %v1565_v21, %v1340_v20  ;;  %vm1348_vm2 = vweird.f32 %v1565_v21 }
 0x2af   :  { %vm1349_vm4 = vmor %vm1347_vm3, %vm1348_vm2 }
 0x2b0   :  { %v1343_v25 = vmul.f32 %v1565_v21, %v1342_v24 }
 0x2b2   :  { %v1344_v28 = vmul.f32 0.5, %v1343_v25 }
 0x2b4   :  { %v1345_v29 = vsub.f32 1.5, %v1344_v28 }
 0x2b6   :  { %v1346_v32 = vmul.f32 %v1565_v21, %v1345_v29 }
 0x2b8   :  { %v1350_v35 = vsel %vm1349_vm4, %v1565_v21, %v1346_v32 }
 0x2b9   :  { %v1351_v36 = vmul.f32 %v1350_v35, %v1339_v31 }
 0x2bb   :  { %1357 = vperm.xlu1 %1562, %v1351_v36   ;;  %v1353_v39 = vmul.f32 %v1351_v36, %v3139_v7 }
 0x2bd   :  { %v1354_v44 = vsub.f32 %v1352_v40, %v1353_v39 }
 0x2c3   :  { %1394 = vperm.xlu1 %1562, %v1354_v44  }
 0x32d   :  { %v3212_v45 = vpop.permute.xlu1 %1357 }
 0x32e   :  { %v1360_v49 = vmul.f32 %v3212_v45, %v3045_v6  ;;  %v1361_v52 = vmul.f32 %v3212_v45, %v3043_v5  ;;  %v1362_v53 = vmul.f32 %v3212_v45, %v3049_v8  ;;  %v1363_v7 = vmul.f32 %v3212_v45, %v3052_v10 }
 0x32f   :  { %v1364_v56 = vmul.f32 %v3212_v45, %v3055_v12  ;;  %v1365_v6 = vmul.f32 %v3212_v45, %v3058_v14  ;;  %v1366_v8 = vmul.f32 %v3212_v45, %v3061_v16  ;;  %v1367_v10 = vmul.f32 %v3212_v45, %v3064_v18 }
 0x330   :  { %v1368_v12 = vmul.f32 %v3212_v45, %v3066_v19  ;;  %v1369_v11 = vmul.f32 %v3212_v45, %v3070_v22  ;;  %v1370_v15 = vmul.f32 %v3212_v45, %v3072_v23  ;;  %v1371_v19 = vmul.f32 %v3212_v45, %v3076_v26 }
 0x331   :  { %v1372_v22 = vmul.f32 %v3212_v45, %v3078_v27  ;;  %v1373_v26 = vmul.f32 %v3212_v45, %v3082_v42  ;;  %v1374_v27 = vmul.f32 %v3212_v45, %v3084_v30  ;;  %v1375_v42 = vmul.f32 %v3212_v45, %v3088_v33 }
 0x332   :  { %v1376_v30 = vmul.f32 %v3212_v45, %v3090_v34  ;;  %v1377_v33 = vmul.f32 %v3212_v45, %v3094_v37  ;;  %v1378_v34 = vmul.f32 %v3212_v45, %v3096_v38  ;;  %v1379_v37 = vmul.f32 %v3212_v45, %v3100_v41 }
 0x333   :  { %v1380_v38 = vmul.f32 %v3212_v45, %v3102_v43  ;;  %v1381_v41 = vmul.f32 %v3212_v45, %v3106_v46  ;;  %v1382_v43 = vmul.f32 %v3212_v45, %v3108_v47  ;;  %v1383_v46 = vmul.f32 %v3212_v45, %v3112_v50 }
 0x334   :  { %v1384_v47 = vmul.f32 %v3212_v45, %v3114_v51  ;;  %v1385_v50 = vmul.f32 %v3212_v45, %v3118_v54  ;;  %v1386_v51 = vmul.f32 %v3212_v45, %v3120_v55  ;;  %v1387_v54 = vmul.f32 %v3212_v45, %v3124_v58 }
 0x335   :  { %v3214_v48 = vpop.permute.xlu1 %1394  ;;  %v1388_v55 = vmul.f32 %v3212_v45, %v3127_v60  ;;  %v1389_v58 = vmul.f32 %v3212_v45, %v3130_v62  ;;  %v1390_v60 = vmul.f32 %v3212_v45, %v3133_v0  ;;  %v1391_v62 = vmul.f32 %v3212_v45, %v3136_v2 }
 0x336   :  { %v1397_v57 = vadd.f32 %v3214_v48, %v1360_v49  ;;  %v1398_v59 = vadd.f32 %v3214_v48, %v1361_v52  ;;  %v1399_v61 = vadd.f32 %v3214_v48, %v1362_v53  ;;  %v1400_v5 = vadd.f32 %v3214_v48, %v1363_v7 }
 0x337   :  { %v1401_v63 = vadd.f32 %v3214_v48, %v1364_v56  ;;  %v1402_v1 = vadd.f32 %v3214_v48, %v1365_v6  ;;  %v1403_v3 = vadd.f32 %v3214_v48, %v1366_v8  ;;  %v1404_v16 = vadd.f32 %v3214_v48, %v1367_v10 }
 0x338   :  { %v1429_v4 = vmax.f32 %v1397_v57, 0.0  ;;  %v1430_v9 = vmax.f32 %v1398_v59, 0.0  ;;  %v1431_v14 = vmax.f32 %v1399_v61, 0.0  ;;  %v1432_v13 = vmax.f32 %v1400_v5, 0.0 }
 0x339   :  { %v1405_v18 = vadd.f32 %v3214_v48, %v1368_v12  ;;  %v1433_v17 = vmax.f32 %v1401_v63, 0.0  ;;  %v1406_v20 = vadd.f32 %v3214_v48, %v1369_v11  ;;  %v1434_v21 = vmax.f32 %v1402_v1, 0.0 }
 0x33a   :  { %1461 = vst [vmem:[%s3412_s4] sm:$0xff] %v1429_v4  ;;  %v1407_v23 = vadd.f32 %v3214_v48, %v1370_v15  ;;  %v1435_v24 = vmax.f32 %v1403_v3, 0.0  ;;  %v1408_v25 = vadd.f32 %v3214_v48, %v1371_v19  ;;  %v1436_v28 = vmax.f32 %v1404_v16, 0.0 }
 0x33b   :  { %1462 = vst [vmem:[%s3412_s4 + $0x8] sm:$0xff] %v1430_v9  ;;  %v1409_v29 = vadd.f32 %v3214_v48, %v1372_v22  ;;  %v1437_v31 = vmax.f32 %v1405_v18, 0.0  ;;  %v1410_v32 = vadd.f32 %v3214_v48, %v1373_v26  ;;  %v1438_v35 = vmax.f32 %v1406_v20, 0.0 }
 0x33c   :  { %1463 = vst [vmem:[%s3412_s4 + $0x10] sm:$0xff] %v1431_v14  ;;  %v1411_v36 = vadd.f32 %v3214_v48, %v1374_v27  ;;  %v1439_v39 = vmax.f32 %v1407_v23, 0.0  ;;  %v1412_v40 = vadd.f32 %v3214_v48, %v1375_v42  ;;  %v1440_v44 = vmax.f32 %v1408_v25, 0.0 }
 0x33d   :  { %1464 = vst [vmem:[%s3412_s4 + $0x18] sm:$0xff] %v1432_v13  ;;  %v1413_v49 = vadd.f32 %v3214_v48, %v1376_v30  ;;  %v1441_v52 = vmax.f32 %v1409_v29, 0.0  ;;  %v1414_v53 = vadd.f32 %v3214_v48, %v1377_v33  ;;  %v1442_v7 = vmax.f32 %v1410_v32, 0.0 }
 0x33e   :  { %1465 = vst [vmem:[%s3412_s4 + $0x20] sm:$0xff] %v1433_v17  ;;  %v1415_v56 = vadd.f32 %v3214_v48, %v1378_v34  ;;  %v1443_v57 = vmax.f32 %v1411_v36, 0.0  ;;  %v1416_v59 = vadd.f32 %v3214_v48, %v1379_v37  ;;  %v1444_v61 = vmax.f32 %v1412_v40, 0.0 }
 0x33f   :  { %1466 = vst [vmem:[%s3412_s4 + $0x28] sm:$0xff] %v1434_v21  ;;  %v1417_v6 = vadd.f32 %v3214_v48, %v1380_v38  ;;  %v1445_v5 = vmax.f32 %v1413_v49, 0.0  ;;  %v1418_v8 = vadd.f32 %v3214_v48, %v1381_v41  ;;  %v1446_v63 = vmax.f32 %v1414_v53, 0.0 }
 0x340   :  { %1467 = vst [vmem:[%s3412_s4 + $0x30] sm:$0xff] %v1435_v24  ;;  %v1419_v10 = vadd.f32 %v3214_v48, %v1382_v43  ;;  %v1447_v12 = vmax.f32 %v1415_v56, 0.0  ;;  %v1420_v1 = vadd.f32 %v3214_v48, %v1383_v46  ;;  %v1448_v3 = vmax.f32 %v1416_v59, 0.0 }
 0x341   :  { %1468 = vst [vmem:[%s3412_s4 + $0x38] sm:$0xff] %v1436_v28  ;;  %v1421_v4 = vadd.f32 %v3214_v48, %v1384_v47  ;;  %v1449_v9 = vmax.f32 %v1417_v6, 0.0  ;;  %v1422_v14 = vadd.f32 %v3214_v48, %v1385_v50  ;;  %v1450_v11 = vmax.f32 %v1418_v8, 0.0 }
 0x342   :  { %1469 = vst [vmem:[%s3412_s4 + $0x40] sm:$0xff] %v1437_v31  ;;  %v1423_v16 = vadd.f32 %v3214_v48, %v1386_v51  ;;  %v1451_v13 = vmax.f32 %v1419_v10, 0.0  ;;  %v1424_v15 = vadd.f32 %v3214_v48, %v1387_v54  ;;  %v1452_v18 = vmax.f32 %v1420_v1, 0.0 }
 0x343   :  { %1470 = vst [vmem:[%s3412_s4 + $0x48] sm:$0xff] %v1438_v35  ;;  %v1425_v17 = vadd.f32 %v3214_v48, %v1388_v55  ;;  %v1453_v19 = vmax.f32 %v1421_v4, 0.0  ;;  %v1426_v20 = vadd.f32 %v3214_v48, %v1389_v58  ;;  %v1454_v21 = vmax.f32 %v1422_v14, 0.0 }
 0x344   :  { %1471 = vst [vmem:[%s3412_s4 + $0x50] sm:$0xff] %v1439_v39  ;;  %v1427_v22 = vadd.f32 %v3214_v48, %v1390_v60  ;;  %v1455_v0 = vmax.f32 %v1423_v16, 0.0  ;;  %v1428_v23 = vadd.f32 %v3214_v48, %v1391_v62  ;;  %v1456_v24 = vmax.f32 %v1424_v15, 0.0 }
 0x345   :  { %1472 = vst [vmem:[%s3412_s4 + $0x58] sm:$0xff] %v1440_v44  ;;  %v1457_v2 = vmax.f32 %v1425_v17, 0.0  ;;  %v1458_v45 = vmax.f32 %v1426_v20, 0.0 }
 0x346   :  { %1473 = vst [vmem:[%s3412_s4 + $0x60] sm:$0xff] %v1441_v52  ;;  %v1459_v26 = vmax.f32 %v1427_v22, 0.0  ;;  %v1460_v48 = vmax.f32 %v1428_v23, 0.0 }
 0x347   :  { %1474 = vst [vmem:[%s3412_s4 + $0x68] sm:$0xff] %v1442_v7 }
 0x348   :  { %1475 = vst [vmem:[%s3412_s4 + $0x70] sm:$0xff] %v1443_v57 }
 0x349   :  { %1476 = vst [vmem:[%s3412_s4 + $0x78] sm:$0xff] %v1444_v61 }
 0x34a   :  { %1477 = vst [vmem:[%s3412_s4 + $0x80] sm:$0xff] %v1445_v5 }
 0x34b   :  { %1478 = vst [vmem:[%s3412_s4 + $0x88] sm:$0xff] %v1446_v63 }
 0x34c   :  { %1479 = vst [vmem:[%s3412_s4 + $0x90] sm:$0xff] %v1447_v12 }
 0x34d   :  { %1480 = vst [vmem:[%s3412_s4 + $0x98] sm:$0xff] %v1448_v3 }
 0x34e   :  { %1481 = vst [vmem:[%s3412_s4 + $0xa0] sm:$0xff] %v1449_v9 }
 0x34f   :  { %1482 = vst [vmem:[%s3412_s4 + $0xa8] sm:$0xff] %v1450_v11 }
 0x350   :  { %1483 = vst [vmem:[%s3412_s4 + $0xb0] sm:$0xff] %v1451_v13 }
 0x351   :  { %1484 = vst [vmem:[%s3412_s4 + $0xb8] sm:$0xff] %v1452_v18 }
 0x352   :  { %1485 = vst [vmem:[%s3412_s4 + $0xc0] sm:$0xff] %v1453_v19 }
 0x353   :  { %1486 = vst [vmem:[%s3412_s4 + $0xc8] sm:$0xff] %v1454_v21 }
 0x354   :  { %1487 = vst [vmem:[%s3412_s4 + $0xd0] sm:$0xff] %v1455_v0 }
 0x355   :  { %1488 = vst [vmem:[%s3412_s4 + $0xd8] sm:$0xff] %v1456_v24 }
 0x356   :  { %1489 = vst [vmem:[%s3412_s4 + $0xe0] sm:$0xff] %v1457_v2 }
 0x357   :  { %1490 = vst [vmem:[%s3412_s4 + $0xe8] sm:$0xff] %v1458_v45 }
 0x358   :  { %1491 = vst [vmem:[%s3412_s4 + $0xf0] sm:$0xff] %v1459_v26 }
 0x359   :  { %1492 = vst [vmem:[%s3412_s4 + $0xf8] sm:$0xff] %v1460_v48 }

</bundles_post_ra>
